<compile_context>
chip_gen: v5e
topology: v5e:2x2
jax: 0.10.0
libtpu: 0.0.40
codegen_flags: <defaults>
</compile_context>

<pallas_src>
import functools
import math

import jax
import jax.numpy as jnp
from jax import lax
from jax.experimental import pallas as pl
from jax.experimental.pallas import tpu as pltpu


# --------------------------------------------------------------------------- #
# Hardware / feature helpers
# --------------------------------------------------------------------------- #

def _tpu_generation():
    try:
        kind = jax.devices()[0].device_kind.lower()
    except Exception:
        return ""
    for g in ("v7", "v6", "v5", "v4"):
        if g in kind:
            return g
    return ""


def _physical_vmem_bytes():
    try:
        info = pltpu.get_tpu_info()
        cap = getattr(info, "vmem_capacity_bytes", None)
        if cap:
            return int(cap)
    except Exception:
        pass
    return (64 if _tpu_generation() == "v7" else 128) * 2 ** 20


@functools.lru_cache(maxsize=None)
def _single_buffer_supported():
    """Feature-detect pl.Buffered(1) (single-buffered constant-index blocks) with a tiny
    probe kernel, so the real pallas_call is never wrapped in a blanket try/except."""
    if not hasattr(pl, "Buffered"):
        return False
    try:
        def _probe(x_ref, o_ref):
            o_ref[...] = x_ref[...] + 1.0

        out = pl.pallas_call(
            _probe,
            out_shape=jax.ShapeDtypeStruct((8, 128), jnp.float32),
            grid=(2,),
            in_specs=[pl.BlockSpec((8, 128), lambda i: (0, 0),
                                   pipeline_mode=pl.Buffered(1))],
            out_specs=pl.BlockSpec((8, 128), lambda i: (0, 0)),
        )(jnp.zeros((8, 128), jnp.float32))
        jax.block_until_ready(out)
        return True
    except Exception:
        return False


def _chunk_size(total, target, align):
    """Largest c <= target dividing `total`, preferring multiples of `align`."""
    if total <= target:
        return total
    best = None
    for c in range(min(target, total), 0, -1):
        if total % c == 0:
            if c % align == 0:
                return c
            if best is None:
                best = c
    return best if best is not None else total


# --------------------------------------------------------------------------- #
# In-kernel math helpers
# --------------------------------------------------------------------------- #

def _erf_approx(x):
    # Abramowitz & Stegun 7.1.26 (max err ~1.5e-7); the approx reciprocal adds ~1e-4,
    # negligible next to the bf16 matmuls feeding this.
    a1, a2, a3, a4, a5 = (0.254829592, -0.284496736, 1.421413741,
                          -1.453152027, 1.061405429)
    p = 0.3275911
    s = jnp.where(x >= 0.0, 1.0, -1.0)
    ax = jnp.abs(x)
    t = pl.reciprocal(1.0 + p * ax, approx=True)          # EUP, not a VALU divide
    poly = ((((a5 * t + a4) * t + a3) * t + a2) * t + a1) * t
    return s * (1.0 - poly * jnp.exp(-ax * ax))


def _gelu_exact(x):
    # Matches torch.nn.functional.gelu (default, erf-based).
    return x * 0.5 * (1.0 + _erf_approx(x * 0.7071067811865476))


# --------------------------------------------------------------------------- #
# Kernel
# --------------------------------------------------------------------------- #

def _encoder_layer_kernel(q_ref, k_ref, v_ref, x_ref, mask_ref,
                          wo_ref, bo_ref, ln1_g_ref, ln1_b_ref,
                          w1_ref, b1_ref, w2_ref, b2_ref,
                          ln2_g_ref, ln2_b_ref,
                          out_ref,
                          *, kc, n_kc, fc, n_fc, eps, exp_bf16):
    f32 = jnp.float32
    bf16 = jnp.bfloat16
    H, TQ, D = q_ref.shape[1], q_ref.shape[2], q_ref.shape[3]
    E = x_ref.shape[2]

    q = q_ref[0]                                           # (H, TQ, D) bf16, pre-scaled

    # ---- attention: flash-style online softmax over key chunks (bounds VMEM) ----
    def kv_step(i, carry):
        m_prev, l_prev, acc_prev = carry
        ks = i * kc
        if not isinstance(ks, int):
            ks = pl.multiple_of(ks, kc)
        k_c = k_ref[0, :, pl.ds(ks, kc), :]                # (H, KC, D) bf16
        v_c = v_ref[0, :, pl.ds(ks, kc), :]                # (H, KC, D) bf16
        # additive key-mask bias: 0 keep / -1e10 masked  (== masked_fill(mask==0, -1e10))
        bias = (mask_ref[0, :, pl.ds(ks, kc)] - 1.0) * f32(1e10)   # (1, KC)
        s = jnp.einsum('hqd,hkd->hqk', q, k_c,
                       preferred_element_type=f32) + bias[None, :, :]
        m_new = jnp.maximum(m_prev, jnp.max(s, axis=-1, keepdims=True))
        alpha = jnp.exp(m_prev - m_new)
        if exp_bf16:
            # bf16 exponent on v6e/v7x (bf16 EUP); accumulation stays f32.
            p_b = jnp.exp((s - m_new).astype(bf16))
            p_sum = jnp.sum(p_b.astype(f32), axis=-1, keepdims=True)
        else:
            p_f = jnp.exp(s - m_new)
            p_sum = jnp.sum(p_f, axis=-1, keepdims=True)
            p_b = p_f.astype(bf16)
        l_new = alpha * l_prev + p_sum
        acc_new = alpha * acc_prev + jnp.einsum('hqk,hkd->hqd', p_b, v_c,
                                                preferred_element_type=f32)
        return m_new, l_new, acc_new

    init = (jnp.full((H, TQ, 1), -jnp.inf, f32),
            jnp.zeros((H, TQ, 1), f32),
            jnp.zeros((H, TQ, D), f32))
    if n_kc <= 4:                                          # short, static: plain unroll
        m_i, l_i, acc = init
        for i in range(n_kc):
            m_i, l_i, acc = kv_step(i, (m_i, l_i, acc))
    else:
        m_i, l_i, acc = lax.fori_loop(0, n_kc, kv_step, init)

    # softmax normalization; attn_dropout = identity (eval mode)
    ctx = (acc * pl.reciprocal(l_i, approx=True)).astype(bf16)     # (H, TQ, D)

    # ---- output projection with the head-concat folded away: sum_h ctx[h] @ Wo[h] ----
    attn_out = jnp.zeros((TQ, E), f32)
    for h in range(H):
        attn_out = attn_out + jnp.dot(ctx[h], wo_ref[h],
                                      preferred_element_type=f32)
    attn_out = attn_out + bo_ref[...]

    # ---- residual + LayerNorm (attn_layer_norm); hidden_dropout = identity ----
    h1 = x_ref[0] + attn_out
    mu1 = jnp.mean(h1, axis=-1, keepdims=True)
    d1 = h1 - mu1
    var1 = jnp.mean(d1 * d1, axis=-1, keepdims=True)
    h1n = d1 * lax.rsqrt(var1 + eps) * ln1_g_ref[...] + ln1_b_ref[...]
    h1n_bf = h1n.astype(bf16)

    # ---- pointwise FFN, tiled over the hidden dim F (bounds the (TQ, F) GELU temp) ----
    def ffn_step(c, acc_o):
        cs = c * fc
        if not isinstance(cs, int):
            cs = pl.multiple_of(cs, fc)
        w1c = w1_ref[:, pl.ds(cs, fc)]                     # (E, FC) bf16
        b1c = b1_ref[:, pl.ds(cs, fc)]                     # (1, FC) f32
        t = jnp.dot(h1n_bf, w1c, preferred_element_type=f32) + b1c
        t = _gelu_exact(t)
        w2c = w2_ref[pl.ds(cs, fc), :]                     # (FC, E) bf16
        return acc_o + jnp.dot(t.astype(bf16), w2c, preferred_element_type=f32)

    ffn = jnp.zeros((TQ, E), f32)
    if n_fc <= 4:
        for c in range(n_fc):
            ffn = ffn_step(c, ffn)
    else:
        ffn = lax.fori_loop(0, n_fc, ffn_step, ffn)
    ffn = ffn + b2_ref[...]

    # ---- residual + LayerNorm (pff_layer_norm); pff_out_drop = identity ----
    h2 = h1n + ffn
    mu2 = jnp.mean(h2, axis=-1, keepdims=True)
    d2 = h2 - mu2
    var2 = jnp.mean(d2 * d2, axis=-1, keepdims=True)
    out = d2 * lax.rsqrt(var2 + eps) * ln2_g_ref[...] + ln2_b_ref[...]

    out_ref[0] = out.astype(out_ref.dtype)


# --------------------------------------------------------------------------- #
# Wrapper
# --------------------------------------------------------------------------- #

def encoder_layer(x, inputs_mask, params, *, nhead, eps,
                  tq=None, key_chunk=512, ffn_chunk=512):
    """Forward of EncoderLayer.  x: [B, L, E] f32; inputs_mask: [B, 1, 1, L] (bool/0-1)."""
    B, L, E = x.shape
    F = params["w1"].shape[1]
    assert E % nhead == 0
    D = E // nhead
    f32, bf16 = jnp.float32, jnp.bfloat16

    gen = _tpu_generation()
    exp_bf16 = gen in ("v6", "v7")                     # v5e has no bf16 EUP
    if tq is None:
        # v6e's 256-wide MXU likes TQ=256; v5e (128^2 MXU) and v7x (64 MiB VMEM) use 128.
        tq = 256 if gen == "v6" else 128

    # Pad L so query tiles stay (8,128)-friendly for awkward sequence lengths.
    if L <= tq:
        tq, Lp = L, L
    else:
        Lp = int(pl.cdiv(L, tq)) * tq
    nq = Lp // tq

    if Lp != L:
        x_p = jnp.pad(x, ((0, 0), (0, Lp - L), (0, 0)))
        mask = jnp.pad(inputs_mask.reshape(B, 1, L).astype(f32),
                       ((0, 0), (0, 0), (0, Lp - L)))    # padded keys -> masked out
    else:
        x_p = x
        mask = inputs_mask.reshape(B, 1, L).astype(f32)

    kc = _chunk_size(Lp, key_chunk, 128)                 # key-dim tile (online softmax)
    n_kc = Lp // kc
    fc = _chunk_size(F, ffn_chunk, 128)                  # hidden-dim tile (FFN)
    n_fc = F // fc

    # ---- fused QKV projection, hoisted out of the kernel (plain XLA bf16 GEMM) ----
    # 1/sqrt(D) folded into Wq/bq; q/k/v handed to the kernel per-head as (B, H, Lp, D).
    inv_scale = 1.0 / math.sqrt(D)
    wqkv = jnp.concatenate([params["wq"] * inv_scale, params["wk"], params["wv"]],
                           axis=1).astype(bf16)                           # (E, 3E)
    bqkv = jnp.concatenate([params["bq"] * inv_scale, params["bk"], params["bv"]],
                           axis=1)                                        # (1, 3E) f32
    qkv = jnp.einsum('ble,ef->blf', x_p.astype(bf16), wqkv,
                     preferred_element_type=f32) + bqkv                   # (B, Lp, 3E)
    qkv = qkv.reshape(B, Lp, 3, nhead, D)
    q = qkv[:, :, 0].transpose(0, 2, 1, 3).astype(bf16)                   # (B, H, Lp, D)
    k = qkv[:, :, 1].transpose(0, 2, 1, 3).astype(bf16)
    v = qkv[:, :, 2].transpose(0, 2, 1, 3).astype(bf16)

    wo = params["wo"].reshape(nhead, D, E).astype(bf16)                   # per-head Wo
    weights = (wo, params["bo"], params["ln1_g"], params["ln1_b"],
               params["w1"].astype(bf16), params["b1"],
               params["w2"].astype(bf16), params["b2"],
               params["ln2_g"], params["ln2_b"])

    # ---- VMEM limit (generation-aware headroom) + advisory cost estimate ----
    vmem_limit = max(32 * 2 ** 20,
                     min(int(0.85 * _physical_vmem_bytes()), 120 * 2 ** 20))
    weight_bytes = sum(int(a.size) * a.dtype.itemsize for a in weights)
    bytes_accessed = int(3 * B * Lp * E * 2 + 2 * B * Lp * E * 4 + B * Lp * 4
                         + weight_bytes)
    flops = int(B * (4 * Lp * Lp * E + 2 * Lp * E * E + 4 * Lp * E * F))
    transcendentals = int(B * (nhead * Lp * Lp + Lp * F))
    cost = pl.CostEstimate(flops=flops, transcendentals=transcendentals,
                           bytes_accessed=bytes_accessed)

    single_buf = _single_buffer_supported()

    def const_spec(shape):
        # Constant-index weight block; keep it single-buffered when supported so weights
        # are not double-buffered in VMEM (matters for large E/F, esp. v7x's 64 MiB).
        nd = len(shape)
        kwargs = {"pipeline_mode": pl.Buffered(1)} if single_buf else {}
        return pl.BlockSpec(shape, lambda b, i: (0,) * nd, **kwargs)

    in_specs = [
        pl.BlockSpec((1, nhead, tq, D), lambda b, i: (b, 0, i, 0)),   # Q tile
        pl.BlockSpec((1, nhead, Lp, D), lambda b, i: (b, 0, 0, 0)),   # K (full seq per b)
        pl.BlockSpec((1, nhead, Lp, D), lambda b, i: (b, 0, 0, 0)),   # V (full seq per b)
        pl.BlockSpec((1, tq, E), lambda b, i: (b, i, 0)),             # x tile (residual)
        pl.BlockSpec((1, 1, Lp), lambda b, i: (b, 0, 0)),             # key mask
        const_spec((nhead, D, E)), const_spec((1, E)),                # Wo, bo
        const_spec((1, E)), const_spec((1, E)),                       # ln1 gamma / beta
        const_spec((E, F)), const_spec((1, F)),                       # W1, b1
        const_spec((F, E)), const_spec((1, E)),                       # W2, b2
        const_spec((1, E)), const_spec((1, E)),                       # ln2 gamma / beta
    ]

    kernel = functools.partial(_encoder_layer_kernel, kc=kc, n_kc=n_kc,
                               fc=fc, n_fc=n_fc, eps=eps, exp_bf16=exp_bf16)

    out = pl.pallas_call(
        kernel,
        out_shape=jax.ShapeDtypeStruct((B, Lp, E), x.dtype),
        grid=(B, nq),
        in_specs=in_specs,
        out_specs=pl.BlockSpec((1, tq, E), lambda b, i: (b, i, 0)),
        compiler_params=pltpu.CompilerParams(
            dimension_semantics=("parallel", "parallel"),   # no carry -> both shardable
            vmem_limit_bytes=vmem_limit),
        cost_estimate=cost,
    )(q, k, v, x_p, mask, *weights)

    return out[:, :L, :] if Lp != L else out


# --------------------------------------------------------------------------- #
# Parameters / pure-JAX reference
# --------------------------------------------------------------------------- #

def init_params(key, embed_size, ffn_hidden):
    """Deterministic init matching nn.Linear / nn.LayerNorm parameter shapes.
    Linear weights are stored pre-transposed as (in, out); biases as (1, out)."""
    ks = jax.random.split(key, 12)

    def linear(kw, kb, fan_in, fan_out):
        bound = 1.0 / math.sqrt(fan_in)
        w = jax.random.uniform(kw, (fan_in, fan_out), jnp.float32, -bound, bound)
        b = jax.random.uniform(kb, (1, fan_out), jnp.float32, -bound, bound)
        return w, b

    wq, bq = linear(ks[0], ks[1], embed_size, embed_size)
    wk, bk = linear(ks[2], ks[3], embed_size, embed_size)
    wv, bv = linear(ks[4], ks[5], embed_size, embed_size)
    wo, bo = linear(ks[6], ks[7], embed_size, embed_size)
    w1, b1 = linear(ks[8], ks[9], embed_size, ffn_hidden)
    w2, b2 = linear(ks[10], ks[11], ffn_hidden, embed_size)

    return dict(
        wq=wq, bq=bq, wk=wk, bk=bk, wv=wv, bv=bv, wo=wo, bo=bo,
        ln1_g=jnp.ones((1, embed_size), jnp.float32),
        ln1_b=jnp.zeros((1, embed_size), jnp.float32),
        w1=w1, b1=b1, w2=w2, b2=b2,
        ln2_g=jnp.ones((1, embed_size), jnp.float32),
        ln2_b=jnp.zeros((1, embed_size), jnp.float32),
    )


def _layer_norm_ref(x, g, b, eps):
    mu = jnp.mean(x, axis=-1, keepdims=True)
    var = jnp.mean((x - mu) ** 2, axis=-1, keepdims=True)
    return (x - mu) * lax.rsqrt(var + eps) * g + b


def encoder_layer_reference(x, inputs_mask, params, *, nhead, eps):
    """Pure-JAX f32 reference with the PyTorch module's exact semantics."""
    B, L, E = x.shape
    D = E // nhead

    def lin(a, w, b):
        return a @ w + b

    q = lin(x, params["wq"], params["bq"]).reshape(B, L, nhead, D).transpose(0, 2, 1, 3)
    k = lin(x, params["wk"], params["bk"]).reshape(B, L, nhead, D).transpose(0, 2, 1, 3)
    v = lin(x, params["wv"], params["bv"]).reshape(B, L, nhead, D).transpose(0, 2, 1, 3)
    energy = jnp.einsum('bhqd,bhkd->bhqk', q, k) / math.sqrt(D)
    m = inputs_mask.reshape(B, 1, 1, L)
    energy = jnp.where(m == 0, -1e10, energy)
    attn = jax.nn.softmax(energy, axis=-1)
    ctx = jnp.einsum('bhqk,bhkd->bhqd', attn, v).transpose(0, 2, 1, 3).reshape(B, L, E)
    attn_out = lin(ctx, params["wo"], params["bo"])
    h1 = _layer_norm_ref(x + attn_out, params["ln1_g"], params["ln1_b"], eps)
    f = jax.nn.gelu(lin(h1, params["w1"], params["b1"]), approximate=False)
    f = lin(f, params["w2"], params["b2"])
    return _layer_norm_ref(h1 + f, params["ln2_g"], params["ln2_b"], eps)


# --------------------------------------------------------------------------- #
# Main
# --------------------------------------------------------------------------- #

if __name__ == "__main__":
    # Small shapes consistent with the module's forward signature.
    B, L, E = 2, 8, 32
    NHEAD, FFN = 4, 64
    LAYER_NORM_EPS = 1e-12

    key = jax.random.PRNGKey(0)
    k_x, k_p = jax.random.split(key)

    x = jax.random.normal(k_x, (B, L, E), jnp.float32)

    # inputs_mask: [B, 1, 1, L] — first sequence fully valid, second has 5 valid tokens.
    lengths = jnp.array([L, 5], jnp.int32)
    inputs_mask = (jnp.arange(L)[None, :] < lengths[:, None]).reshape(B, 1, 1, L)

    params = init_params(k_p, E, FFN)

    out = encoder_layer(x, inputs_mask, params, nhead=NHEAD, eps=LAYER_NORM_EPS)
    jax.block_until_ready(out)
    assert out.shape == (B, L, E) and out.dtype == jnp.float32

    ref = encoder_layer_reference(x, inputs_mask, params,
                                  nhead=NHEAD, eps=LAYER_NORM_EPS)
    max_err = float(jnp.max(jnp.abs(out - ref)))
    # bf16 matmuls + approx softmax / erf reciprocals -> loose but meaningful tolerance.
    assert max_err < 0.15, f"max abs error vs reference: {max_err}"

    print("KERNEL_OK")
</pallas_src>

<mosaic_0001>
module attributes {stable_mosaic.version = 11 : i64} {
  func.func @_probe(%arg0: i32, %arg1: memref<8x128xf32, #tpu.memory_space<vmem>>, %arg2: memref<8x128xf32, #tpu.memory_space<vmem>>) attributes {dimension_semantics = [#tpu.dimension_semantics<arbitrary>], iteration_bounds = array<i64: 2>, scalar_prefetch = 0 : i64, scratch_operands = 0 : i64, tpu.core_type = #tpu.core_type<tc>, window_params = [{pipeline_mode = #tpu.pipeline_mode<synchronous>, transform_indices = @transform_0, window_bounds = array<i64: 8, 128>}, {pipeline_mode = #tpu.pipeline_mode<synchronous>, transform_indices = @transform_1, window_bounds = array<i64: 8, 128>}]} {
    %c0 = arith.constant 0 : index
    %c0_0 = arith.constant 0 : index
    %0 = vector.load %arg1[%c0, %c0_0] : memref<8x128xf32, #tpu.memory_space<vmem>>, vector<8x128xf32>
    %cst = arith.constant 1.000000e+00 : f32
    %1 = vector.broadcast %cst : f32 to vector<8x128xf32>
    %2 = arith.addf %0, %1 : vector<8x128xf32>
    %c0_1 = arith.constant 0 : index
    %c0_2 = arith.constant 0 : index
    %3 = vector.load %arg2[%c0_1, %c0_2] : memref<8x128xf32, #tpu.memory_space<vmem>>, vector<8x128xf32>
    tpu.vector_store %arg2[%c0_1, %c0_2], %2 {strides = array<i32>} : memref<8x128xf32, #tpu.memory_space<vmem>>, vector<8x128xf32>,
    return
  }
  func.func @transform_0(%arg0: i32) -> (i32, i32) {
    %c0_i32 = arith.constant 0 : i32
    %c0_i32_0 = arith.constant 0 : i32
    %c0_i32_1 = arith.constant 0 : i32
    return %c0_i32, %c0_i32_0 : i32, i32
  }
  func.func @transform_1(%arg0: i32) -> (i32, i32) {
    %c0_i32 = arith.constant 0 : i32
    %c0_i32_0 = arith.constant 0 : i32
    %c0_i32_1 = arith.constant 0 : i32
    return %c0_i32, %c0_i32_0 : i32, i32
  }
}

module attributes {stable_mosaic.version = 11 : i64} {
  func.func @_encoder_layer_kernel(%arg0: i32, %arg1: i32, %arg2: memref<1x4x8x8xbf16, #tpu.memory_space<vmem>>, %arg3: memref<1x4x8x8xbf16, #tpu.memory_space<vmem>>, %arg4: memref<1x4x8x8xbf16, #tpu.memory_space<vmem>>, %arg5: memref<1x8x32xf32, #tpu.memory_space<vmem>>, %arg6: memref<1x1x8xf32, #tpu.memory_space<vmem>>, %arg7: memref<4x8x32xbf16, #tpu.memory_space<vmem>>, %arg8: memref<1x32xf32, #tpu.memory_space<vmem>>, %arg9: memref<1x32xf32, #tpu.memory_space<vmem>>, %arg10: memref<1x32xf32, #tpu.memory_space<vmem>>, %arg11: memref<32x64xbf16, #tpu.memory_space<vmem>>, %arg12: memref<1x64xf32, #tpu.memory_space<vmem>>, %arg13: memref<64x32xbf16, #tpu.memory_space<vmem>>, %arg14: memref<1x32xf32, #tpu.memory_space<vmem>>, %arg15: memref<1x32xf32, #tpu.memory_space<vmem>>, %arg16: memref<1x32xf32, #tpu.memory_space<vmem>>, %arg17: memref<1x8x32xf32, #tpu.memory_space<vmem>>) attributes {dimension_semantics = [#tpu.dimension_semantics<parallel>, #tpu.dimension_semantics<parallel>], iteration_bounds = array<i64: 2, 1>, scalar_prefetch = 0 : i64, scratch_operands = 0 : i64, tpu.core_type = #tpu.core_type<tc>, window_params = [{transform_indices = @transform_0, window_bounds = array<i64: 1, 4, 8, 8>}, {transform_indices = @transform_1, window_bounds = array<i64: 1, 4, 8, 8>}, {transform_indices = @transform_2, window_bounds = array<i64: 1, 4, 8, 8>}, {transform_indices = @transform_3, window_bounds = array<i64: 1, 8, 32>}, {transform_indices = @transform_4, window_bounds = array<i64: 1, 1, 8>}, {pipeline_mode = #tpu.pipeline_mode<synchronous>, transform_indices = @transform_5, window_bounds = array<i64: 4, 8, 32>}, {pipeline_mode = #tpu.pipeline_mode<synchronous>, transform_indices = @transform_6, window_bounds = array<i64: 1, 32>}, {pipeline_mode = #tpu.pipeline_mode<synchronous>, transform_indices = @transform_7, window_bounds = array<i64: 1, 32>}, {pipeline_mode = #tpu.pipeline_mode<synchronous>, transform_indices = @transform_8, window_bounds = array<i64: 1, 32>}, {pipeline_mode = #tpu.pipeline_mode<synchronous>, transform_indices = @transform_9, window_bounds = array<i64: 32, 64>}, {pipeline_mode = #tpu.pipeline_mode<synchronous>, transform_indices = @transform_10, window_bounds = array<i64: 1, 64>}, {pipeline_mode = #tpu.pipeline_mode<synchronous>, transform_indices = @transform_11, window_bounds = array<i64: 64, 32>}, {pipeline_mode = #tpu.pipeline_mode<synchronous>, transform_indices = @transform_12, window_bounds = array<i64: 1, 32>}, {pipeline_mode = #tpu.pipeline_mode<synchronous>, transform_indices = @transform_13, window_bounds = array<i64: 1, 32>}, {pipeline_mode = #tpu.pipeline_mode<synchronous>, transform_indices = @transform_14, window_bounds = array<i64: 1, 32>}, {transform_indices = @transform_15, window_bounds = array<i64: 1, 8, 32>}]} {
    %c0 = arith.constant 0 : index
    %c0_0 = arith.constant 0 : index
    %c0_1 = arith.constant 0 : index
    %c0_2 = arith.constant 0 : index
    %0 = vector.load %arg2[%c0, %c0_0, %c0_1, %c0_2] : memref<1x4x8x8xbf16, #tpu.memory_space<vmem>>, vector<1x4x8x8xbf16>
    %1 = vector.shape_cast %0 : vector<1x4x8x8xbf16> to vector<4x8x8xbf16>
    %cst = arith.constant 0xFF800000 : f32
    %2 = vector.broadcast %cst : f32 to vector<4x8x1xf32>
    %cst_3 = arith.constant 0.000000e+00 : f32
    %3 = vector.broadcast %cst_3 : f32 to vector<4x8x1xf32>
    %cst_4 = arith.constant 0.000000e+00 : f32
    %4 = vector.broadcast %cst_4 : f32 to vector<4x8x8xf32>
    %c0_5 = arith.constant 0 : index
    %c0_6 = arith.constant 0 : index
    %c0_7 = arith.constant 0 : index
    %c0_8 = arith.constant 0 : index
    %5 = vector.load %arg3[%c0_5, %c0_6, %c0_7, %c0_8] : memref<1x4x8x8xbf16, #tpu.memory_space<vmem>>, vector<1x4x8x8xbf16>
    %6 = vector.shape_cast %5 : vector<1x4x8x8xbf16> to vector<4x8x8xbf16>
    %c0_9 = arith.constant 0 : index
    %c0_10 = arith.constant 0 : index
    %c0_11 = arith.constant 0 : index
    %c0_12 = arith.constant 0 : index
    %7 = vector.load %arg4[%c0_9, %c0_10, %c0_11, %c0_12] : memref<1x4x8x8xbf16, #tpu.memory_space<vmem>>, vector<1x4x8x8xbf16>
    %8 = vector.shape_cast %7 : vector<1x4x8x8xbf16> to vector<4x8x8xbf16>
    %c0_13 = arith.constant 0 : index
    %c0_14 = arith.constant 0 : index
    %c0_15 = arith.constant 0 : index
    %9 = vector.load %arg6[%c0_13, %c0_14, %c0_15] : memref<1x1x8xf32, #tpu.memory_space<vmem>>, vector<1x1x8xf32>
    %10 = vector.shape_cast %9 : vector<1x1x8xf32> to vector<1x8xf32>
    %cst_16 = arith.constant 1.000000e+00 : f32
    %11 = vector.broadcast %cst_16 : f32 to vector<1x8xf32>
    %12 = arith.subf %10, %11 : vector<1x8xf32>
    %cst_17 = arith.constant 1.000000e+10 : f32
    %13 = vector.broadcast %cst_17 : f32 to vector<1x8xf32>
    %14 = arith.mulf %12, %13 : vector<1x8xf32>
    "tpu.trace_start"() <{level = 10 : i32, message = "hqd,hkd->hqk"}> : () -> ()
    %cst_18 = arith.constant dense<0.000000e+00> : vector<4x8x8xf32>
    %15 = tpu.matmul %1, %6, %cst_18 {dimension_numbers = #tpu.dot_dimension_numbers<[2], [2], [1], [1], [0, 0, 0, 1, 1, 1], [0], [0]>} : vector<4x8x8xbf16>, vector<4x8x8xbf16>, vector<4x8x8xf32> -> vector<4x8x8xf32>
    "tpu.trace_stop"() : () -> ()
    %16 = vector.shape_cast %14 : vector<1x8xf32> to vector<1x1x8xf32>
    %17 = vector.broadcast %16 : vector<1x1x8xf32> to vector<4x8x8xf32>
    %18 = arith.addf %15, %17 : vector<4x8x8xf32>
    %cst_19 = arith.constant dense<0xFF800000> : vector<4x8xf32>
    %19 = vector.multi_reduction <maximumf>, %18, %cst_19 [2] : vector<4x8x8xf32> to vector<4x8xf32>
    %20 = vector.shape_cast %19 : vector<4x8xf32> to vector<4x8x1xf32>
    %21 = arith.maximumf %2, %20 : vector<4x8x1xf32>
    %22 = arith.subf %2, %21 : vector<4x8x1xf32>
    %23 = math.exp %22 : vector<4x8x1xf32>
    %24 = vector.broadcast %21 : vector<4x8x1xf32> to vector<4x8x8xf32>
    %25 = arith.subf %18, %24 : vector<4x8x8xf32>
    %26 = math.exp %25 : vector<4x8x8xf32>
    %cst_20 = arith.constant dense<0.000000e+00> : vector<4x8xf32>
    %27 = vector.multi_reduction <add>, %26, %cst_20 [2] : vector<4x8x8xf32> to vector<4x8xf32>
    %28 = vector.shape_cast %27 : vector<4x8xf32> to vector<4x8x1xf32>
    %29 = arith.truncf %26 : vector<4x8x8xf32> to vector<4x8x8xbf16>
    %30 = arith.mulf %23, %3 : vector<4x8x1xf32>
    %31 = arith.addf %30, %28 : vector<4x8x1xf32>
    %32 = vector.broadcast %23 : vector<4x8x1xf32> to vector<4x8x8xf32>
    %33 = arith.mulf %32, %4 : vector<4x8x8xf32>
    "tpu.trace_start"() <{level = 10 : i32, message = "hqk,hkd->hqd"}> : () -> ()
    %cst_21 = arith.constant dense<0.000000e+00> : vector<4x8x8xf32>
    %34 = tpu.matmul %29, %8, %cst_21 {dimension_numbers = #tpu.dot_dimension_numbers<[2], [1], [1], [2], [0, 0, 0, 1, 1, 2], [0], [0]>} : vector<4x8x8xbf16>, vector<4x8x8xbf16>, vector<4x8x8xf32> -> vector<4x8x8xf32>
    "tpu.trace_stop"() : () -> ()
    %35 = arith.addf %33, %34 : vector<4x8x8xf32>
    %36 = tpu.reciprocal %31 {approx = true} : vector<4x8x1xf32> -> vector<4x8x1xf32>
    %37 = vector.broadcast %36 : vector<4x8x1xf32> to vector<4x8x8xf32>
    %38 = arith.mulf %35, %37 : vector<4x8x8xf32>
    %39 = arith.truncf %38 : vector<4x8x8xf32> to vector<4x8x8xbf16>
    %cst_22 = arith.constant 0.000000e+00 : f32
    %40 = vector.broadcast %cst_22 : f32 to vector<8x32xf32>
    %41 = vector.extract_strided_slice %39 {offsets = [0, 0, 0], sizes = [1, 8, 8], strides = [1, 1, 1]} : vector<4x8x8xbf16> to vector<1x8x8xbf16>
    %42 = vector.shape_cast %41 : vector<1x8x8xbf16> to vector<8x8xbf16>
    %c0_23 = arith.constant 0 : index
    %c0_24 = arith.constant 0 : index
    %c0_25 = arith.constant 0 : index
    %43 = vector.load %arg7[%c0_23, %c0_24, %c0_25] : memref<4x8x32xbf16, #tpu.memory_space<vmem>>, vector<1x8x32xbf16>
    %44 = vector.shape_cast %43 : vector<1x8x32xbf16> to vector<8x32xbf16>
    %cst_26 = arith.constant dense<0.000000e+00> : vector<8x32xf32>
    %45 = tpu.matmul %42, %44, %cst_26 {dimension_numbers = #tpu.dot_dimension_numbers<[1], [0], [0], [1], [0, 0, 1, 1], [], []>} : vector<8x8xbf16>, vector<8x32xbf16>, vector<8x32xf32> -> vector<8x32xf32>
    %46 = arith.addf %40, %45 : vector<8x32xf32>
    %47 = vector.extract_strided_slice %39 {offsets = [1, 0, 0], sizes = [1, 8, 8], strides = [1, 1, 1]} : vector<4x8x8xbf16> to vector<1x8x8xbf16>
    %48 = vector.shape_cast %47 : vector<1x8x8xbf16> to vector<8x8xbf16>
    %c1 = arith.constant 1 : index
    %c0_27 = arith.constant 0 : index
    %c0_28 = arith.constant 0 : index
    %49 = vector.load %arg7[%c1, %c0_27, %c0_28] : memref<4x8x32xbf16, #tpu.memory_space<vmem>>, vector<1x8x32xbf16>
    %50 = vector.shape_cast %49 : vector<1x8x32xbf16> to vector<8x32xbf16>
    %cst_29 = arith.constant dense<0.000000e+00> : vector<8x32xf32>
    %51 = tpu.matmul %48, %50, %cst_29 {dimension_numbers = #tpu.dot_dimension_numbers<[1], [0], [0], [1], [0, 0, 1, 1], [], []>} : vector<8x8xbf16>, vector<8x32xbf16>, vector<8x32xf32> -> vector<8x32xf32>
    %52 = arith.addf %46, %51 : vector<8x32xf32>
    %53 = vector.extract_strided_slice %39 {offsets = [2, 0, 0], sizes = [1, 8, 8], strides = [1, 1, 1]} : vector<4x8x8xbf16> to vector<1x8x8xbf16>
    %54 = vector.shape_cast %53 : vector<1x8x8xbf16> to vector<8x8xbf16>
    %c2 = arith.constant 2 : index
    %c0_30 = arith.constant 0 : index
    %c0_31 = arith.constant 0 : index
    %55 = vector.load %arg7[%c2, %c0_30, %c0_31] : memref<4x8x32xbf16, #tpu.memory_space<vmem>>, vector<1x8x32xbf16>
    %56 = vector.shape_cast %55 : vector<1x8x32xbf16> to vector<8x32xbf16>
    %cst_32 = arith.constant dense<0.000000e+00> : vector<8x32xf32>
    %57 = tpu.matmul %54, %56, %cst_32 {dimension_numbers = #tpu.dot_dimension_numbers<[1], [0], [0], [1], [0, 0, 1, 1], [], []>} : vector<8x8xbf16>, vector<8x32xbf16>, vector<8x32xf32> -> vector<8x32xf32>
    %58 = arith.addf %52, %57 : vector<8x32xf32>
    %59 = vector.extract_strided_slice %39 {offsets = [3, 0, 0], sizes = [1, 8, 8], strides = [1, 1, 1]} : vector<4x8x8xbf16> to vector<1x8x8xbf16>
    %60 = vector.shape_cast %59 : vector<1x8x8xbf16> to vector<8x8xbf16>
    %c3 = arith.constant 3 : index
    %c0_33 = arith.constant 0 : index
    %c0_34 = arith.constant 0 : index
    %61 = vector.load %arg7[%c3, %c0_33, %c0_34] : memref<4x8x32xbf16, #tpu.memory_space<vmem>>, vector<1x8x32xbf16>
    %62 = vector.shape_cast %61 : vector<1x8x32xbf16> to vector<8x32xbf16>
    %cst_35 = arith.constant dense<0.000000e+00> : vector<8x32xf32>
    %63 = tpu.matmul %60, %62, %cst_35 {dimension_numbers = #tpu.dot_dimension_numbers<[1], [0], [0], [1], [0, 0, 1, 1], [], []>} : vector<8x8xbf16>, vector<8x32xbf16>, vector<8x32xf32> -> vector<8x32xf32>
    %64 = arith.addf %58, %63 : vector<8x32xf32>
    %c0_36 = arith.constant 0 : index
    %c0_37 = arith.constant 0 : index
    %65 = vector.load %arg8[%c0_36, %c0_37] : memref<1x32xf32, #tpu.memory_space<vmem>>, vector<1x32xf32>
    %66 = vector.broadcast %65 : vector<1x32xf32> to vector<8x32xf32>
    %67 = arith.addf %64, %66 : vector<8x32xf32>
    %c0_38 = arith.constant 0 : index
    %c0_39 = arith.constant 0 : index
    %c0_40 = arith.constant 0 : index
    %68 = vector.load %arg5[%c0_38, %c0_39, %c0_40] : memref<1x8x32xf32, #tpu.memory_space<vmem>>, vector<1x8x32xf32>
    %69 = vector.shape_cast %68 : vector<1x8x32xf32> to vector<8x32xf32>
    %70 = arith.addf %69, %67 : vector<8x32xf32>
    %cst_41 = arith.constant dense<0.000000e+00> : vector<8xf32>
    %71 = vector.multi_reduction <add>, %70, %cst_41 [1] : vector<8x32xf32> to vector<8xf32>
    %72 = vector.shape_cast %71 : vector<8xf32> to vector<8x1xf32>
    %cst_42 = arith.constant 3.200000e+01 : f32
    %73 = vector.broadcast %cst_42 : f32 to vector<8x1xf32>
    %74 = arith.divf %72, %73 : vector<8x1xf32>
    %75 = vector.broadcast %74 : vector<8x1xf32> to vector<8x32xf32>
    %76 = arith.subf %70, %75 : vector<8x32xf32>
    %77 = arith.mulf %76, %76 : vector<8x32xf32>
    %cst_43 = arith.constant dense<0.000000e+00> : vector<8xf32>
    %78 = vector.multi_reduction <add>, %77, %cst_43 [1] : vector<8x32xf32> to vector<8xf32>
    %79 = vector.shape_cast %78 : vector<8xf32> to vector<8x1xf32>
    %cst_44 = arith.constant 3.200000e+01 : f32
    %80 = vector.broadcast %cst_44 : f32 to vector<8x1xf32>
    %81 = arith.divf %79, %80 : vector<8x1xf32>
    %cst_45 = arith.constant 9.99999996E-13 : f32
    %82 = vector.broadcast %cst_45 : f32 to vector<8x1xf32>
    %83 = arith.addf %81, %82 : vector<8x1xf32>
    %84 = math.rsqrt %83 : vector<8x1xf32>
    %85 = vector.broadcast %84 : vector<8x1xf32> to vector<8x32xf32>
    %86 = arith.mulf %76, %85 : vector<8x32xf32>
    %c0_46 = arith.constant 0 : index
    %c0_47 = arith.constant 0 : index
    %87 = vector.load %arg9[%c0_46, %c0_47] : memref<1x32xf32, #tpu.memory_space<vmem>>, vector<1x32xf32>
    %88 = vector.broadcast %87 : vector<1x32xf32> to vector<8x32xf32>
    %89 = arith.mulf %86, %88 : vector<8x32xf32>
    %c0_48 = arith.constant 0 : index
    %c0_49 = arith.constant 0 : index
    %90 = vector.load %arg10[%c0_48, %c0_49] : memref<1x32xf32, #tpu.memory_space<vmem>>, vector<1x32xf32>
    %91 = vector.broadcast %90 : vector<1x32xf32> to vector<8x32xf32>
    %92 = arith.addf %89, %91 : vector<8x32xf32>
    %93 = arith.truncf %92 : vector<8x32xf32> to vector<8x32xbf16>
    %cst_50 = arith.constant 0.000000e+00 : f32
    %94 = vector.broadcast %cst_50 : f32 to vector<8x32xf32>
    %c0_51 = arith.constant 0 : index
    %c0_52 = arith.constant 0 : index
    %95 = vector.load %arg11[%c0_51, %c0_52] : memref<32x64xbf16, #tpu.memory_space<vmem>>, vector<32x64xbf16>
    %c0_53 = arith.constant 0 : index
    %c0_54 = arith.constant 0 : index
    %96 = vector.load %arg12[%c0_53, %c0_54] : memref<1x64xf32, #tpu.memory_space<vmem>>, vector<1x64xf32>
    %cst_55 = arith.constant dense<0.000000e+00> : vector<8x64xf32>
    %97 = tpu.matmul %93, %95, %cst_55 {dimension_numbers = #tpu.dot_dimension_numbers<[1], [0], [0], [1], [0, 0, 1, 1], [], []>} : vector<8x32xbf16>, vector<32x64xbf16>, vector<8x64xf32> -> vector<8x64xf32>
    %98 = vector.broadcast %96 : vector<1x64xf32> to vector<8x64xf32>
    %99 = arith.addf %97, %98 : vector<8x64xf32>
    %cst_56 = arith.constant 5.000000e-01 : f32
    %100 = vector.broadcast %cst_56 : f32 to vector<8x64xf32>
    %101 = arith.mulf %99, %100 : vector<8x64xf32>
    %cst_57 = arith.constant 0.707106769 : f32
    %102 = vector.broadcast %cst_57 : f32 to vector<8x64xf32>
    %103 = arith.mulf %99, %102 : vector<8x64xf32>
    %cst_58 = arith.constant 0.000000e+00 : f32
    %104 = vector.broadcast %cst_58 : f32 to vector<8x64xf32>
    %105 = arith.cmpf oge, %103, %104 : vector<8x64xf32>
    %cst_59 = arith.constant 1.000000e+00 : f32
    %cst_60 = arith.constant -1.000000e+00 : f32
    %106 = vector.broadcast %cst_59 : f32 to vector<8x64xf32>
    %107 = vector.broadcast %cst_60 : f32 to vector<8x64xf32>
    %108 = arith.select %105, %106, %107 : vector<8x64xi1>, vector<8x64xf32>
    %109 = math.absf %103 : vector<8x64xf32>
    %cst_61 = arith.constant 0.327591091 : f32
    %110 = vector.broadcast %cst_61 : f32 to vector<8x64xf32>
    %111 = arith.mulf %110, %109 : vector<8x64xf32>
    %cst_62 = arith.constant 1.000000e+00 : f32
    %112 = vector.broadcast %cst_62 : f32 to vector<8x64xf32>
    %113 = arith.addf %112, %111 : vector<8x64xf32>
    %114 = tpu.reciprocal %113 {approx = true} : vector<8x64xf32> -> vector<8x64xf32>
    %cst_63 = arith.constant 1.06140542 : f32
    %115 = vector.broadcast %cst_63 : f32 to vector<8x64xf32>
    %116 = arith.mulf %115, %114 : vector<8x64xf32>
    %cst_64 = arith.constant -1.45315206 : f32
    %117 = vector.broadcast %cst_64 : f32 to vector<8x64xf32>
    %118 = arith.addf %116, %117 : vector<8x64xf32>
    %119 = arith.mulf %118, %114 : vector<8x64xf32>
    %cst_65 = arith.constant 1.42141378 : f32
    %120 = vector.broadcast %cst_65 : f32 to vector<8x64xf32>
    %121 = arith.addf %119, %120 : vector<8x64xf32>
    %122 = arith.mulf %121, %114 : vector<8x64xf32>
    %cst_66 = arith.constant -0.284496725 : f32
    %123 = vector.broadcast %cst_66 : f32 to vector<8x64xf32>
    %124 = arith.addf %122, %123 : vector<8x64xf32>
    %125 = arith.mulf %124, %114 : vector<8x64xf32>
    %cst_67 = arith.constant 0.254829586 : f32
    %126 = vector.broadcast %cst_67 : f32 to vector<8x64xf32>
    %127 = arith.addf %125, %126 : vector<8x64xf32>
    %128 = arith.mulf %127, %114 : vector<8x64xf32>
    %cst_68 = arith.constant 0.000000e+00 : f32
    %129 = vector.broadcast %cst_68 : f32 to vector<8x64xf32>
    %130 = arith.subf %129, %109 : vector<8x64xf32>
    %131 = arith.mulf %130, %109 : vector<8x64xf32>
    %132 = math.exp %131 : vector<8x64xf32>
    %133 = arith.mulf %128, %132 : vector<8x64xf32>
    %cst_69 = arith.constant 1.000000e+00 : f32
    %134 = vector.broadcast %cst_69 : f32 to vector<8x64xf32>
    %135 = arith.subf %134, %133 : vector<8x64xf32>
    %136 = arith.mulf %108, %135 : vector<8x64xf32>
    %cst_70 = arith.constant 1.000000e+00 : f32
    %137 = vector.broadcast %cst_70 : f32 to vector<8x64xf32>
    %138 = arith.addf %137, %136 : vector<8x64xf32>
    %139 = arith.mulf %101, %138 : vector<8x64xf32>
    %c0_71 = arith.constant 0 : index
    %c0_72 = arith.constant 0 : index
    %140 = vector.load %arg13[%c0_71, %c0_72] : memref<64x32xbf16, #tpu.memory_space<vmem>>, vector<64x32xbf16>
    %141 = arith.truncf %139 : vector<8x64xf32> to vector<8x64xbf16>
    %cst_73 = arith.constant dense<0.000000e+00> : vector<8x32xf32>
    %142 = tpu.matmul %141, %140, %cst_73 {dimension_numbers = #tpu.dot_dimension_numbers<[1], [0], [0], [1], [0, 0, 1, 1], [], []>} : vector<8x64xbf16>, vector<64x32xbf16>, vector<8x32xf32> -> vector<8x32xf32>
    %143 = arith.addf %94, %142 : vector<8x32xf32>
    %c0_74 = arith.constant 0 : index
    %c0_75 = arith.constant 0 : index
    %144 = vector.load %arg14[%c0_74, %c0_75] : memref<1x32xf32, #tpu.memory_space<vmem>>, vector<1x32xf32>
    %145 = vector.broadcast %144 : vector<1x32xf32> to vector<8x32xf32>
    %146 = arith.addf %143, %145 : vector<8x32xf32>
    %147 = arith.addf %92, %146 : vector<8x32xf32>
    %cst_76 = arith.constant dense<0.000000e+00> : vector<8xf32>
    %148 = vector.multi_reduction <add>, %147, %cst_76 [1] : vector<8x32xf32> to vector<8xf32>
    %149 = vector.shape_cast %148 : vector<8xf32> to vector<8x1xf32>
    %cst_77 = arith.constant 3.200000e+01 : f32
    %150 = vector.broadcast %cst_77 : f32 to vector<8x1xf32>
    %151 = arith.divf %149, %150 : vector<8x1xf32>
    %152 = vector.broadcast %151 : vector<8x1xf32> to vector<8x32xf32>
    %153 = arith.subf %147, %152 : vector<8x32xf32>
    %154 = arith.mulf %153, %153 : vector<8x32xf32>
    %cst_78 = arith.constant dense<0.000000e+00> : vector<8xf32>
    %155 = vector.multi_reduction <add>, %154, %cst_78 [1] : vector<8x32xf32> to vector<8xf32>
    %156 = vector.shape_cast %155 : vector<8xf32> to vector<8x1xf32>
    %cst_79 = arith.constant 3.200000e+01 : f32
    %157 = vector.broadcast %cst_79 : f32 to vector<8x1xf32>
    %158 = arith.divf %156, %157 : vector<8x1xf32>
    %cst_80 = arith.constant 9.99999996E-13 : f32
    %159 = vector.broadcast %cst_80 : f32 to vector<8x1xf32>
    %160 = arith.addf %158, %159 : vector<8x1xf32>
    %161 = math.rsqrt %160 : vector<8x1xf32>
    %162 = vector.broadcast %161 : vector<8x1xf32> to vector<8x32xf32>
    %163 = arith.mulf %153, %162 : vector<8x32xf32>
    %c0_81 = arith.constant 0 : index
    %c0_82 = arith.constant 0 : index
    %164 = vector.load %arg15[%c0_81, %c0_82] : memref<1x32xf32, #tpu.memory_space<vmem>>, vector<1x32xf32>
    %165 = vector.broadcast %164 : vector<1x32xf32> to vector<8x32xf32>
    %166 = arith.mulf %163, %165 : vector<8x32xf32>
    %c0_83 = arith.constant 0 : index
    %c0_84 = arith.constant 0 : index
    %167 = vector.load %arg16[%c0_83, %c0_84] : memref<1x32xf32, #tpu.memory_space<vmem>>, vector<1x32xf32>
    %168 = vector.broadcast %167 : vector<1x32xf32> to vector<8x32xf32>
    %169 = arith.addf %166, %168 : vector<8x32xf32>
    %c0_85 = arith.constant 0 : index
    %c0_86 = arith.constant 0 : index
    %c0_87 = arith.constant 0 : index
    %170 = vector.load %arg17[%c0_85, %c0_86, %c0_87] : memref<1x8x32xf32, #tpu.memory_space<vmem>>, vector<1x8x32xf32>
    %171 = vector.shape_cast %170 : vector<1x8x32xf32> to vector<8x32xf32>
    %172 = vector.shape_cast %169 : vector<8x32xf32> to vector<1x8x32xf32>
    tpu.vector_store %arg17[%c0_85, %c0_86, %c0_87], %172 {strides = array<i32>} : memref<1x8x32xf32, #tpu.memory_space<vmem>>, vector<1x8x32xf32>,
    return
  }
  func.func @transform_0(%arg0: i32, %arg1: i32) -> (i32, i32, i32, i32) {
    %c0_i32 = arith.constant 0 : i32
    %c0_i32_0 = arith.constant 0 : i32
    %c0_i32_1 = arith.constant 0 : i32
    return %arg0, %c0_i32, %arg1, %c0_i32_0 : i32, i32, i32, i32
  }
  func.func @transform_1(%arg0: i32, %arg1: i32) -> (i32, i32, i32, i32) {
    %c0_i32 = arith.constant 0 : i32
    %c0_i32_0 = arith.constant 0 : i32
    %c0_i32_1 = arith.constant 0 : i32
    %c0_i32_2 = arith.constant 0 : i32
    return %arg0, %c0_i32, %c0_i32_0, %c0_i32_1 : i32, i32, i32, i32
  }
  func.func @transform_2(%arg0: i32, %arg1: i32) -> (i32, i32, i32, i32) {
    %c0_i32 = arith.constant 0 : i32
    %c0_i32_0 = arith.constant 0 : i32
    %c0_i32_1 = arith.constant 0 : i32
    %c0_i32_2 = arith.constant 0 : i32
    return %arg0, %c0_i32, %c0_i32_0, %c0_i32_1 : i32, i32, i32, i32
  }
  func.func @transform_3(%arg0: i32, %arg1: i32) -> (i32, i32, i32) {
    %c0_i32 = arith.constant 0 : i32
    %c0_i32_0 = arith.constant 0 : i32
    return %arg0, %arg1, %c0_i32 : i32, i32, i32
  }
  func.func @transform_4(%arg0: i32, %arg1: i32) -> (i32, i32, i32) {
    %c0_i32 = arith.constant 0 : i32
    %c0_i32_0 = arith.constant 0 : i32
    %c0_i32_1 = arith.constant 0 : i32
    return %arg0, %c0_i32, %c0_i32_0 : i32, i32, i32
  }
  func.func @transform_5(%arg0: i32, %arg1: i32) -> (i32, i32, i32) {
    %c0_i32 = arith.constant 0 : i32
    %c0_i32_0 = arith.constant 0 : i32
    %c0_i32_1 = arith.constant 0 : i32
    %c0_i32_2 = arith.constant 0 : i32
    return %c0_i32, %c0_i32_0, %c0_i32_1 : i32, i32, i32
  }
  func.func @transform_6(%arg0: i32, %arg1: i32) -> (i32, i32) {
    %c0_i32 = arith.constant 0 : i32
    %c0_i32_0 = arith.constant 0 : i32
    %c0_i32_1 = arith.constant 0 : i32
    return %c0_i32, %c0_i32_0 : i32, i32
  }
  func.func @transform_7(%arg0: i32, %arg1: i32) -> (i32, i32) {
    %c0_i32 = arith.constant 0 : i32
    %c0_i32_0 = arith.constant 0 : i32
    %c0_i32_1 = arith.constant 0 : i32
    return %c0_i32, %c0_i32_0 : i32, i32
  }
  func.func @transform_8(%arg0: i32, %arg1: i32) -> (i32, i32) {
    %c0_i32 = arith.constant 0 : i32
    %c0_i32_0 = arith.constant 0 : i32
    %c0_i32_1 = arith.constant 0 : i32
    return %c0_i32, %c0_i32_0 : i32, i32
  }
  func.func @transform_9(%arg0: i32, %arg1: i32) -> (i32, i32) {
    %c0_i32 = arith.constant 0 : i32
    %c0_i32_0 = arith.constant 0 : i32
    %c0_i32_1 = arith.constant 0 : i32
    return %c0_i32, %c0_i32_0 : i32, i32
  }
  func.func @transform_10(%arg0: i32, %arg1: i32) -> (i32, i32) {
    %c0_i32 = arith.constant 0 : i32
    %c0_i32_0 = arith.constant 0 : i32
    %c0_i32_1 = arith.constant 0 : i32
    return %c0_i32, %c0_i32_0 : i32, i32
  }
  func.func @transform_11(%arg0: i32, %arg1: i32) -> (i32, i32) {
    %c0_i32 = arith.constant 0 : i32
    %c0_i32_0 = arith.constant 0 : i32
    %c0_i32_1 = arith.constant 0 : i32
    return %c0_i32, %c0_i32_0 : i32, i32
  }
  func.func @transform_12(%arg0: i32, %arg1: i32) -> (i32, i32) {
    %c0_i32 = arith.constant 0 : i32
    %c0_i32_0 = arith.constant 0 : i32
    %c0_i32_1 = arith.constant 0 : i32
    return %c0_i32, %c0_i32_0 : i32, i32
  }
  func.func @transform_13(%arg0: i32, %arg1: i32) -> (i32, i32) {
    %c0_i32 = arith.constant 0 : i32
    %c0_i32_0 = arith.constant 0 : i32
    %c0_i32_1 = arith.constant 0 : i32
    return %c0_i32, %c0_i32_0 : i32, i32
  }
  func.func @transform_14(%arg0: i32, %arg1: i32) -> (i32, i32) {
    %c0_i32 = arith.constant 0 : i32
    %c0_i32_0 = arith.constant 0 : i32
    %c0_i32_1 = arith.constant 0 : i32
    return %c0_i32, %c0_i32_0 : i32, i32
  }
  func.func @transform_15(%arg0: i32, %arg1: i32) -> (i32, i32, i32) {
    %c0_i32 = arith.constant 0 : i32
    %c0_i32_0 = arith.constant 0 : i32
    return %arg0, %arg1, %c0_i32 : i32, i32, i32
  }
}

</mosaic_0001>

<bundles_post_ra>
// kernel: tpu_custom_call.1
= control target key start
LH: loop header
LB: loop body
LE: loop exit
PB: predicated region body
PF: predicated region fallthrough
CT: control target
= control target key end

     0   :  { %6 = vsyncpa [#allocation3], 0  ;;  %s287_s0 = inlined_call_operand.hbm [shape: f32[8,128], index: 0, kind: input, shape index: {}]   ;;  %s288_s1 = inlined_call_operand.hbm [shape: f32[8,128], index: 1, kind: output, shape index: {}]  }
   0x1   :  { %7 = vsyncpa [#allocation4], 0  ;;  %s270_s6 = smov 0  }
   0x2 LB: > { %s149_s7 = sadd.s32 4294967295, %s256_s6   ;;  %p150_p0 = scmp.ge.s32.totalorder %s256_s6, 1  ;;  %s256_s6 = sphi %s270_s6, %s13_s6  }
   0x3   : > { %p60_p1 = scmp.lt.s32.totalorder %s256_s6, 3  ;;  %s72_s10 = sshll.u32 %s287_s0, 4  ;;  %s73_s10 = int_to_ptr.hbm [resolvable:$true] %s72_s10 }
   0x4   : > { %p170_p3 = scmp.eq.s32.totalorder %s149_s7, 0  ;;  %s258_s11 = smov [#allocation2]  }
   0x5   : > { %p61_p2 = pnand %p150_p0, %p60_p1  ;;  %s74_s12 = sshll.u32 %s258_s11, 4  ;;  %s75_s12 = int_to_ptr.vmem [resolvable:$true] %s74_s12 }
   0x7   : > { %p166_p4 = pneg %p61_p2  ;;  %87 = sbr.rel (%p61_p2) target bundleno = 20 (0x14), region = 24 }
   0x9   : > { %p167_p5 = pnand %p170_p3, %p166_p4 }
   0xb   : > { %169 = dma.hbm_to_vmem [thread:$0]  (!%p167_p5), %s73_s10, 128, %s75_s12, [#allocation3]  }
   0xc   : > { %247 = dma.done.wait (%p170_p3), [#allocation3], 128  }
   0xd   : > { %249 = vsyncadd (%p170_p3), [#allocation3], 4294967168  ;;  %s259_s13 = smov [#allocation5]   ;;  %s109_s17 = sshll.u32 %s288_s1, 4  ;;  %v98_v0 = vld [vmem:[#allocation2] sm:$0xff]  ;;  %s110_s17 = int_to_ptr.hbm [resolvable:$true] %s109_s17 }
   0xe   : > { %s107_s14 = sshll.u32 %s259_s13, 4  ;;  %p172_p6 = scmp.eq.s32.totalorder %s149_s7, 1  ;;  %v99_v1 = vadd.f32 1.0, %v98_v0  ;;  %s108_s14 = int_to_ptr.vmem [resolvable:$true] %s107_s14 }
  0x10   : > { %100 = vst [vmem:[#allocation5] sm:$0xff] %v99_v1 }
  0x11   : > { %163 = dma.vmem_to_hbm [thread:$0]  (%p172_p6), %s108_s14, 128, %s110_s17, [#allocation4]  }
  0x12   : > { %251 = dma.done.wait (%p172_p6), [#allocation4], 128  }
  0x13   : > { %253 = vsyncadd (%p172_p6), [#allocation4], 4294967168 }
  0x14 PF: > { %s13_s6 = sadd.s32 1, %s256_s6  }
  0x15   : > { %p10_p7 = scmp.ge.s32.totalorder %s13_s6, 4  }
  0x17   :  { %12 = sbr.rel (!%p10_p7) target bundleno = 2 (0x2), region = 53 }
  0x1c   :  { %123 = vsyncpa [#allocation3], 1 }
  0x1d   :  { %125 = vsyncpa [#allocation3 + $0x1], 1 }
  0x1e   :  { %126 = vsyncpa [#allocation4], 1 }
  0x1f   :  { %128 = vsyncpa [#allocation4 + $0x1], 1 }

// kernel: tpu_custom_call.1
= control target key start
LH: loop header
LB: loop body
LE: loop exit
PB: predicated region body
PF: predicated region fallthrough
CT: control target
= control target key end

     0   :  { %s2172_s0 = inlined_call_operand.vmem [shape: bf16[2,4,8,8], index: 0, kind: input, shape index: {}]   ;;  %s2173_s1 = inlined_call_operand.hbm [shape: bf16[2,4,8,8], index: 1, kind: input, shape index: {}]   ;;  %s2174_s2 = inlined_call_operand.hbm [shape: bf16[2,4,8,8], index: 2, kind: input, shape index: {}]   ;;  %s2175_s3 = inlined_call_operand.vmem [shape: f32[2,8,32], index: 3, kind: input, shape index: {}]   ;;  %s2176_s4 = inlined_call_operand.vmem [shape: f32[2,1,8], index: 4, kind: input, shape index: {}]   ;;  %s2177_s5 = inlined_call_operand.hbm [shape: bf16[4,8,32], index: 5, kind: input, shape index: {}]   ;;  %s2178_s6 = inlined_call_operand.vmem [shape: f32[1,32], index: 6, kind: input, shape index: {}]   ;;  %s2179_s7 = inlined_call_operand.vmem [shape: f32[1,32], index: 7, kind: input, shape index: {}]   ;;  %s2180_s8 = inlined_call_operand.vmem [shape: f32[1,32], index: 8, kind: input, shape index: {}]   ;;  %s2181_s9 = inlined_call_operand.hbm [shape: bf16[32,64], index: 9, kind: input, shape index: {}]   ;;  %s2182_s10 = inlined_call_operand.vmem [shape: f32[1,64], index: 10, kind: input, shape index: {}]   ;;  %s2183_s11 = inlined_call_operand.vmem [shape: bf16[64,32], index: 11, kind: input, shape index: {}]   ;;  %s2184_s12 = inlined_call_operand.vmem [shape: f32[1,32], index: 12, kind: input, shape index: {}]   ;;  %s2185_s13 = inlined_call_operand.vmem [shape: f32[1,32], index: 13, kind: input, shape index: {}]   ;;  %s2186_s14 = inlined_call_operand.vmem [shape: f32[1,32], index: 14, kind: input, shape index: {}]   ;;  %s2187_s15 = inlined_call_operand.hbm [shape: f32[2,8,32], index: 15, kind: output, shape index: {}]  }
   0x1   :  { %2201 = sst [smem:[#allocation23_spill]] %s2177_s5 }
   0x2   :  { %2202 = sst [smem:[#allocation24_spill]] %s2180_s8 }
   0x3   :  { %2203 = sst [smem:[#allocation25_spill]] %s2181_s9 }
   0x4   :  { %2204 = sst [smem:[#allocation26_spill]] %s2182_s10 }
   0x5   :  { %2205 = sst [smem:[#allocation27_spill]] %s2183_s11 }
   0x6   :  { %2206 = sst [smem:[#allocation28_spill]] %s2184_s12 }
   0x7   :  { %2207 = sst [smem:[#allocation29_spill]] %s2185_s13 }
   0x8   :  { %2208 = sst [smem:[#allocation30_spill]] %s2186_s14 }
   0x9   :  { %2209 = sst [smem:[#allocation31_spill]] %s2187_s15 }
   0xa   :  { %20 = vsyncpa [#allocation3], 0 }
   0xb   :  { %22 = vsyncpa [#allocation3 + $0x1], 0 }
   0xc   :  { %23 = vsyncpa [#allocation6], 0 }
   0xd   :  { %25 = vsyncpa [#allocation6 + $0x1], 0 }
   0xe   :  { %26 = vsyncpa [#allocation9], 0 }
   0xf   :  { %27 = vsyncpa [#allocation4], 0 }
  0x10   :  { %29 = vsyncpa [#allocation4 + $0x1], 0  ;;  %s1897_s18 = smov 0   ;;  %s1899_s19 = smov 0  }
  0x11   :  { %s1901_s20 = smov 0   ;;  %s1903_s21 = smov 0  }
  0x12   :  { %s1905_s22 = smov 0   ;;  %s1907_s23 = smov 0  }
  0x13 LB: > { %2210 = sst [smem:[#allocation16_spill]] %s1789_s18  ;;  %s1928_s24 = sadd.s32 4294967295, %s1809_s23   ;;  %s1809_s23 = sphi %s1907_s23, %s35_s23   ;;  %s1805_s22 = sphi %s1905_s22, %s2239_s22   ;;  %s1801_s21 = sphi %s1903_s21, %s2238_s21   ;;  %s1797_s20 = sphi %s1901_s20, %s2237_s20   ;;  %s1793_s19 = sphi %s1899_s19, %s2241_s19   ;;  %s1789_s18 = sphi %s1897_s18, %s2240_s18  }
  0x14   : > { %2211 = sst [smem:[#allocation17_spill]] %s1797_s20  ;;  %s1390_s25 = sadd.s32 4294967294, %s1809_s23  }
  0x15   : > { %2212 = sst [smem:[#allocation18_spill]] %s1805_s22  ;;  %p95_p0 = scmp.ne.s32.totalorder %s1793_s19, %s1789_s18 }
  0x16   : > { %p96_p1 = scmp.eq.s32.totalorder %s1928_s24, 0  ;;  %p411_p2 = scmp.eq.s32.totalorder %s1928_s24, 1 }
  0x17   : > { %p417_p3 = scmp.eq.s32.totalorder %s1390_s25, 1  ;;  %p1391_p5 = scmp.ge.s32.totalorder %s1809_s23, 1 }
  0x18   : > { %p1937_p4 = por %p96_p1, %p95_p0  ;;  %p424_p7 = scmp.lt.s32.totalorder %s1809_s23, 3 }
  0x19   : > { %p1942_p6 = por %p417_p3, %p95_p0  ;;  %s2216_s5 = sld [smem:[#allocation23_spill]] }
  0x1a   : > { %p1950_p8 = pnand %p1391_p5, %p424_p7  ;;  %s1811_s17 = smov [#allocation7]  }
  0x1b   : > { %s2214_s27 = scalar_select %p1942_p6, 1, 0 }
  0x1c   : > { %p1476_p9 = pneg %p1950_p8  ;;  %s437_s25 = sshll.u32 %s1811_s17, 4  ;;  %s438_s25 = int_to_ptr.vmem [resolvable:$true] %s437_s25 }
  0x1d   : > { %2215 = sst [smem:[#allocation19_spill]] %s2214_s27  ;;  %p1394_p11 = scmp.ge.s32.totalorder %s1809_s23, 2 }
  0x1e   : > { %p1477_p10 = pnand %p1476_p9, %p96_p1  ;;  %s2218_s9 = sld [smem:[#allocation25_spill]] }
  0x1f   : > { %s435_s30 = sshll.u32 %s2216_s5, 4  ;;  %s2190_s27 = smov 64   ;;  %s436_s30 = int_to_ptr.hbm [resolvable:$true] %s435_s30 }
  0x20   : > { %s2192_s18 = smov 4   ;;  %s1814_s17 = smov [#allocation8]  }
  0x21   : > { %1479 = dma.hbm_to_vmem [thread:$0]  (!%p1477_p10), %s436_s30, 256, %s438_s25, [#allocation6], %s2190_s27, %s2190_s27, %s2192_s18  }
  0x22   : > { %s460_s14 = sshll.u32 %s1814_s17, 4  ;;  %s47_s28 = sadd.s32 1, %s1805_s22  ;;  %s461_s14 = int_to_ptr.vmem [resolvable:$true] %s460_s14 }
  0x23   : > { %s82_s29 = sadd.s32 1, %s1797_s20  ;;  %p49_p12 = scmp.ge.s32.totalorder %s47_s28, 2 }
  0x24   : > { %s458_s5 = sshll.u32 %s2218_s9, 4  ;;  %p89_p13 = scmp.ne.s32.totalorder %s1797_s20, %s1793_s19  ;;  %s459_s5 = int_to_ptr.hbm [resolvable:$true] %s458_s5 }
  0x25   : > { %1482 = dma.hbm_to_vmem [thread:$0]  (!%p1477_p10), %s459_s5, 256, %s461_s14, [#allocation9], %s2190_s27, %s2190_s27, %s2192_s18  }
  0x26   : > { %p90_p0 = scmp.eq.s32.totalorder %s1809_s23, 0  ;;  %p1496_p3 = scmp.lt.s32.totalorder %s1809_s23, 2 }
  0x27   : > { %s2243_s28 = smov (%p49_p12, %s47_s28), 0  ;;  %p1982_p7 = por %p411_p2, %p89_p13 }
  0x28   : > { %2219 = sst [smem:[#allocation20_spill]] %s2243_s28  ;;  %p1976_p5 = por %p90_p0, %p89_p13 }
  0x29   : > { %s2221_s25 = scalar_select %p1982_p7, 1, 0 }
  0x2a   : > { %s79_s5 = ssub.s32 %s1805_s22, %s2243_s28  ;;  %s500_s14 = sand.u32 1, %s1797_s20  }
  0x2b   : > { %2222 = sst [smem:[#allocation21_spill]] %s2221_s25  ;;  %p80_p9 = scmp.eq.s32.totalorder %s79_s5, 0 }
  0x2c   : > { %s1395_s17 = sshll.u32 %s500_s14, 4  ;;  %s1453_s27 = sshll.u32 %s1805_s22, 4 }
  0x2d   : > { %s1991_s18 = scalar_select %p80_p9, %s1797_s20, %s82_s29  }
  0x2e   : > { %s509_s13 = scalar_lea.hbm %s2173_s1, %s1453_s27  ;;  %s504_s11 = scalar_lea.vmem [#allocation2], %s1395_s17 }
  0x2f   : > { %2223 = sst [smem:[#allocation22_spill]] %s1991_s18  ;;  %s510_s12 = sshll.u32 %s509_s13, 4  ;;  %s511_s12 = int_to_ptr.hbm [resolvable:$true] %s510_s12 }
  0x30   : > { %s512_s10 = sshll.u32 %s504_s11, 4  ;;  %p1484_p2 = pnand %p1496_p3, %p1976_p5  ;;  %s513_s10 = int_to_ptr.vmem [resolvable:$true] %s512_s10 }
  0x31   : > { %s531_s5 = scalar_lea.hbm %s2174_s2, %s1453_s27  ;;  %s526_s22 = scalar_lea.vmem [#allocation5], %s1395_s17 }
  0x32   : > { %s534_s29 = sshll.u32 %s526_s22, 4  ;;  %s532_s18 = sshll.u32 %s531_s5, 4  ;;  %s533_s18 = int_to_ptr.hbm [resolvable:$true] %s532_s18  ;;  %s535_s29 = int_to_ptr.vmem [resolvable:$true] %s534_s29 }
  0x33   : > { %s501_s20 = scalar_lea.sflag [#allocation3], %s500_s14  ;;  %s2224_s8 = smov 4  }
  0x34   : > { %s2225_s9 = smov 64   ;;  %s522_s11 = sand.u32 1, %s1809_s23  }
  0x35   : > { %1486 = dma.hbm_to_vmem [thread:$0]  (!%p1484_p2), %s511_s12, 256, %s513_s10, %s501_s20, %s2225_s9, %s2225_s9, %s2224_s8  }
  0x36   : > { %s523_s13 = scalar_lea.sflag [#allocation6], %s522_s11  ;;  %562 = sbr.rel (%p1950_p8) target bundleno = 1469 (0x5bd), region = 80 }
  0x37   : > { %1489 = dma.hbm_to_vmem [thread:$0]  (!%p1484_p2), %s533_s18, 256, %s535_s29, %s523_s13, %s2225_s9, %s2225_s9, %s2224_s8  }
  0x38   : > { %s2013_s15 = sand.u32 (!%p1950_p8), 1, %s1793_s19  }
  0x39   : > { %s1402_s22 = sshll.u32 (!%p1950_p8), %s2013_s15, 4  ;;  %s565_s27 = scalar_lea.sflag (!%p1950_p8), [#allocation3], %s2013_s15 }
  0x3a   : > { %s568_s10 = scalar_lea.vmem (!%p1950_p8), [#allocation2], %s1402_s22 }
  0x3b   : > { %1768 = dma.done.wait (%p1937_p4), %s565_s27, 256  }
  0x3c   : > { %1770 = vsyncadd (%p1937_p4), %s565_s27, 4294967040  ;;  %s574_s8 = sand.u32 1, %s1928_s24   ;;  %s2022_s18 = scalar_lea.vmem [#allocation5], %s1402_s22 }
  0x3d   : > { %s575_s12 = scalar_lea.sflag [#allocation6], %s574_s8 }
  0x3e   : > { %1772 = dma.done.wait (%p1937_p4), %s575_s12, 256  }
  0x3f   : > { %1774 = vsyncadd (%p1937_p4), %s575_s12, 4294967040 }
  0x40   : > { %1776 = dma.done.wait (%p96_p1), [#allocation6], 256  }
  0x41   : > { %1778 = vsyncadd (%p96_p1), [#allocation6], 4294967040 }
  0x42   : > { %1780 = dma.done.wait (%p96_p1), [#allocation9], 256  }
  0x43   : > { %1782 = vsyncadd (%p96_p1), [#allocation9], 4294967040  ;;  %p659_p8 = scmp.lt.s32.totalorder %s1801_s21, 1  ;;  %vm696_vm0 = vcmask 64512   ;;  %v682_v0 = vld [vmem:[%s568_s10] sm:$0xf] }
  0x44   : > { %v684_v1 = vld [vmem:[%s568_s10 + $0x8] sm:$0xf]  ;;  %v685_v2 = vld [vmem:[%s568_s10 + $0xc] sm:$0xf]  ;;  %v701_v3 = vsel %vm696_vm0, %v682_v0, 0  ;;  %vm836_vm1 = vcmask 1043456  }
  0x45   : > { %s2038_s20 = scalar_select %p659_p8, %s1801_s21, 1  ;;  %v739_v4 = vsel %vm696_vm0, %v684_v1, 0  ;;  %v758_v5 = vsel %vm696_vm0, %v685_v2, 0  ;;  %710 = vmatpush.bf16.xpose.msra.mxu0 %v701_v3  ;;  %v683_v6 = vld [vmem:[%s568_s10 + $0x4] sm:$0xf]  ;;  %vm1018_vm2 = vcmask 261120  }
  0x46   : > { %748 = vmatpush.bf16.xpose.msra.mxu2 %v739_v4  ;;  %767 = vmatpush.bf16.xpose.msra.mxu3 %v758_v5  ;;  %v720_v7 = vsel %vm696_vm0, %v683_v6, 0  ;;  %v686_v32 = vld [vmem:[%s2022_s18] sm:$0xf]  ;;  %v688_v34 = vld [vmem:[%s2022_s18 + $0x8] sm:$0xf]  ;;  %s2226_s12 = sld [smem:[#allocation24_spill]] }
  0x47   : > { %s1455_s26 = sshll.u32 %s2038_s20, 4  ;;  %729 = vmatpush.bf16.xpose.msra.mxu1 %v720_v7  ;;  %s676_s14 = scalar_lea.vmem %s2176_s4, %s2038_s20  ;;  %v838_v33 = vsel %vm836_vm1, %v686_v32, 0  ;;  %v689_v35 = vld [vmem:[%s2022_s18 + $0xc] sm:$0xf]  ;;  %v876_v36 = vsel %vm836_vm1, %v688_v34, 0  ;;  %vm1158_vm8 = vcmask 523264  }
  0x48   : > { %s666_s28 = scalar_lea.vmem %s2172_s0, %s1455_s26  ;;  %v690_v12 = vld [vmem:[%s676_s14] sm:$0x1]  ;;  %v895_v37 = vsel %vm836_vm1, %v689_v35, 0  ;;  %v687_v38 = vld [vmem:[%s2022_s18 + $0x4] sm:$0xf]  ;;  %s1409_s17 = sshll.u32 %s2038_s20, 3 }
  0x49   : > { %v678_v8 = vld [vmem:[%s666_s28] sm:$0xf]  ;;  %v680_v9 = vld [vmem:[%s666_s28 + $0x8] sm:$0xf]  ;;  %v681_v10 = vld [vmem:[%s666_s28 + $0xc] sm:$0xf]  ;;  %s673_s13 = scalar_lea.vmem %s2175_s3, %s1409_s17 }
  0x4a   : > { %v679_v11 = vld [vmem:[%s666_s28 + $0x4] sm:$0xf]  ;;  %v1410_v13 = vadd.f32 -1.0, %v690_v12  ;;  %v857_v39 = vsel %vm836_vm1, %v687_v38, 0  ;;  %v926_v0 = vld [vmem:[#allocation7] sm:$0xf] }
  0x4b   : > { %v952_v1 = vsel %vm836_vm1, %v926_v0, 0  ;;  %v928_v4 = vld [vmem:[#allocation7 + $0x4] sm:$0xf]  ;;  %v968_v7 = vld [vmem:[#allocation7 + $0x8] sm:$0xf]  ;;  %s2227_s26 = sld [smem:[#allocation26_spill]] }
  0x4c   : > { %1411 = vmatmul.msk.bf16.vlgmr.msra.gmra.mxu0 %vm696_vm0, %v678_v8  ;;  %v692_v14 = vmul.f32 1e+10, %v1410_v13  ;;  %v933_v5 = vsel %vm836_vm1, %v928_v4, 0  ;;  %v990_v8 = vld [vmem:[#allocation7 + $0xc] sm:$0xf]  ;;  %s2228_s28 = sld [smem:[#allocation27_spill]] }
  0x4d   : > { %1413 = vmatmul.msk.bf16.vlgmr.msra.gmra.mxu2 %vm696_vm0, %v680_v9  ;;  %1414 = vmatmul.msk.bf16.vlgmr.msra.gmra.mxu3 %vm696_vm0, %v681_v10  ;;  %v973_v9 = vsel %vm836_vm1, %v968_v7, 0  ;;  %v995_v10 = vsel %vm836_vm1, %v990_v8, 0  ;;  %v1815_v8 = vmov 32.0   ;;  %s1406_s22 = sshll.u32 %s2013_s15, 3  ;;  %s1450_s27 = sshll.u32 %s1801_s21, 3 }
  0x4e   : > { %1412 = vmatmul.msk.bf16.vlgmr.msra.gmra.mxu1 %vm696_vm0, %v679_v11  ;;  %v694_v15 = vperm.slane %v692_v14, 0  ;;  %847 = vmatpush.bf16.msrb.mxu0 %v838_v33  ;;  %s2233_s14 = sld [smem:[#allocation30_spill]]  ;;  %s658_s21 = scalar_lea.vmem [#allocation10], %s1406_s22 }
  0x4f   : > { %885 = vmatpush.bf16.msrb.mxu2 %v876_v36  ;;  %904 = vmatpush.bf16.msrb.mxu3 %v895_v37  ;;  %s1223_s17 = sshll.u32 %s658_s21, 4  ;;  %s1210_s29 = scalar_lea.sflag [#allocation4], %s2013_s15  ;;  %s1224_s17 = int_to_ptr.vmem [resolvable:$true] %s1223_s17 }
  0x50   : > { %866 = vmatpush.bf16.msrb.mxu1 %v857_v39 }
  0x52   : > { %942 = vmatpush.bf16.msra.mxu0 %v933_v5 }
  0x53   : > { %982 = vmatpush.bf16.msra.mxu2 %v973_v9  ;;  %1004 = vmatpush.bf16.msra.mxu3 %v995_v10 }
  0x54   : > { %961 = vmatpush.bf16.msra.mxu1 %v952_v1 }
  0xc9   : > { %v712_v16 = vpop.f32.mrf.mxu0 }
  0xca   : > { %v713_v17 = vadd.f32 %v712_v16, %v694_v15 }
  0xcb   : > { %v731_v18 = vpop.f32.mrf.mxu1 }
  0xcc   : > { %v773_v19 = vsel %vm696_vm0, %v713_v17, -inf  ;;  %v732_v20 = vadd.f32 %v731_v18, %v694_v15 }
  0xcd   : > { %774 = vmax.xlane.f32.xlu1 %v773_v19 }
  0xce   : > { %v776_v26 = vsel %vm696_vm0, %v732_v20, -inf }
  0xd0   : > { %v750_v21 = vpop.f32.mrf.mxu2  ;;  %v769_v23 = vpop.f32.mrf.mxu3 }
  0xd1   : > { %v751_v22 = vadd.f32 %v750_v21, %v694_v15  ;;  %v714_v24 = vpop.f32.mrf.mxu0  ;;  %v770_v28 = vadd.f32 %v769_v23, %v694_v15 }
  0xd3   : > { %v779_v25 = vsel %vm696_vm0, %v751_v22, -inf  ;;  %v733_v27 = vpop.f32.mrf.mxu1  ;;  %v782_v31 = vsel %vm696_vm0, %v770_v28, -inf }
  0xd4   : > { %780 = vmax.xlane.f32.xlu0 %v779_v25 }
  0xd5   : > { %777 = vmax.xlane.f32.xlu1 %v776_v26 }
  0xd8   : > { %v752_v29 = vpop.f32.mrf.mxu2  ;;  %v771_v30 = vpop.f32.mrf.mxu3 }
  0xdc   : > { %783 = vmax.xlane.f32.xlu0 %v782_v31 }
 0x140   : > { %v775_v40 = vpop.xlane.xlu1 %774 }
 0x141   : > { %v797_v41 = vsub.f32 %v713_v17, %v775_v40  ;;  %v785_v2 = vsub.f32 -inf, %v775_v40 }
 0x143   : > { %v801_v42 = vmul.f32 1.442695, %v797_v41  ;;  %v789_v3 = vmul.f32 1.442695, %v785_v2 }
 0x145   : > { %1561 = vpow2.f32 %v801_v42 }
 0x147   : > { %v781_v43 = vpop.xlane.xlu0 %780 }
 0x148   : > { %v799_v44 = vsub.f32 %v751_v22, %v781_v43  ;;  %v778_v45 = vpop.xlane.xlu1 %777  ;;  %v787_v11 = vsub.f32 -inf, %v781_v43 }
 0x149   : > { %v798_v47 = vsub.f32 %v732_v20, %v778_v45  ;;  %v786_v6 = vsub.f32 -inf, %v778_v45 }
 0x14a   : > { %v805_v46 = vmul.f32 1.442695, %v799_v44  ;;  %v793_v14 = vmul.f32 1.442695, %v787_v11 }
 0x14b   : > { %v803_v48 = vmul.f32 1.442695, %v798_v47  ;;  %v1562_v49 = vpop.eup %1561  ;;  %v791_v12 = vmul.f32 1.442695, %v786_v6 }
 0x14c   : > { %1563 = vpow2.f32 %v805_v46  ;;  %v809_v50 = vsel %vm696_vm0, %v1562_v49, 0.0  ;;  %v821_v51 = vpack.c.bf16 %v1562_v49, %v1562_v49 }
 0x14d   : > { %1565 = vpow2.f32 %v803_v48  ;;  %810 = vadd.xlane.f32.xlu0 %v809_v50 }
 0x14e   : > { %1415 = vmatmul.msk.bf16.vlgmr.msrb.gmra.mxu0 %vm696_vm0, %v821_v51 }
 0x14f   : > { %v784_v52 = vpop.xlane.xlu0 %783 }
 0x150   : > { %v800_v53 = vsub.f32 %v770_v28, %v784_v52  ;;  %v788_v18 = vsub.f32 -inf, %v784_v52 }
 0x152   : > { %v807_v54 = vmul.f32 1.442695, %v800_v53  ;;  %v1564_v55 = vpop.eup %1563  ;;  %v795_v20 = vmul.f32 1.442695, %v788_v18 }
 0x153   : > { %v815_v56 = vsel %vm696_vm0, %v1564_v55, 0.0  ;;  %v823_v57 = vpack.c.bf16 %v1564_v55, %v1564_v55  ;;  %v1566_v58 = vpop.eup %1565 }
 0x154   : > { %1567 = vpow2.f32 %v807_v54  ;;  %816 = vadd.xlane.f32.xlu2 %v815_v56  ;;  %v812_v59 = vsel %vm696_vm0, %v1566_v58, 0.0  ;;  %v822_v60 = vpack.c.bf16 %v1566_v58, %v1566_v58 }
 0x155   : > { %1417 = vmatmul.msk.bf16.vlgmr.msrb.gmra.mxu2 %vm696_vm0, %v823_v57  ;;  %813 = vadd.xlane.f32.xlu1 %v812_v59  ;;  %1569 = vpow2.f32 %v789_v3  ;;  %v1016_v3 = vld [vmem:[%s673_s13] sm:$0xff]  ;;  %s2229_s13 = sld [smem:[#allocation28_spill]] }
 0x156   : > { %1416 = vmatmul.msk.bf16.vlgmr.msrb.gmra.mxu1 %vm696_vm0, %v822_v60  ;;  %1571 = vpow2.f32 %v791_v12 }
 0x157   : > { %1573 = vpow2.f32 %v793_v14 }
 0x15a   : > { %v1568_v61 = vpop.eup %1567 }
 0x15b   : > { %v818_v62 = vsel %vm696_vm0, %v1568_v61, 0.0  ;;  %v824_v63 = vpack.c.bf16 %v1568_v61, %v1568_v61  ;;  %v1570_v13 = vpop.eup %1569 }
 0x15c   : > { %819 = vadd.xlane.f32.xlu2 %v818_v62  ;;  %v825_v16 = vmul.f32 0.0, %v1570_v13  ;;  %v1572_v19 = vpop.eup %1571 }
 0x15d   : > { %1418 = vmatmul.msk.bf16.vlgmr.msrb.gmra.mxu3 %vm696_vm0, %v824_v63  ;;  %v826_v22 = vmul.f32 0.0, %v1572_v19  ;;  %v1574_v23 = vpop.eup %1573  ;;  %v1554_v63 = vld [vmem:[%s2178_s6] ss:$0 sm:$0xff] }
 0x15e   : > { %v827_v29 = vmul.f32 0.0, %v1574_v23 }
 0x1c0   : > { %v811_v15 = vpop.xlane.xlu0 %810 }
 0x1c1   : > { %v829_v17 = vadd.f32 %v825_v16, %v811_v15 }
 0x1c3   : > { %1575 = vrcp.f32 %v829_v17 }
 0x1c4   : > { %1577 = vpow2.f32 %v795_v20  ;;  %v1457_v20 = vld [vmem:[#allocation8 + $0x8] sm:$0xff] }
 0x1c5   : > { %1088 = vmatpush.bf16.msrb.mxu0 %v1457_v20 }
 0x1c7   : > { %v817_v24 = vpop.xlane.xlu2 %816 }
 0x1c8   : > { %v814_v21 = vpop.xlane.xlu1 %813  ;;  %v831_v31 = vadd.f32 %v827_v29, %v817_v24 }
 0x1c9   : > { %v830_v25 = vadd.f32 %v826_v22, %v814_v21  ;;  %v1576_v28 = vpop.eup %1575  ;;  %v1456_v21 = vld [vmem:[#allocation8] sm:$0xff] }
 0x1ca   : > { %v1578_v33 = vpop.eup %1577  ;;  %1089 = vmatpush.bf16.msrb.mxu0 %v1456_v21 }
 0x1cb   : > { %v849_v26 = vpop.f32.mrf.mxu0  ;;  %1579 = vrcp.f32 %v830_v25  ;;  %v828_v39 = vmul.f32 0.0, %v1578_v33  ;;  %v1556_v33 = vld [vmem:[%s2226_s12] ss:$0 sm:$0xff]  ;;  %s2230_s12 = sld [smem:[#allocation29_spill]] }
 0x1cc   : > { %v910_v27 = vadd.f32 %v849_v26, %v825_v16  ;;  %1581 = vrcp.f32 %v831_v31  ;;  %v1555_v31 = vld [vmem:[%s2179_s7] ss:$0 sm:$0xff] }
 0x1ce   : > { %v918_v30 = vmul.f32 %v1576_v28, %v910_v27 }
 0x1cf   : > { %v820_v36 = vpop.xlane.xlu2 %819 }
 0x1d0   : > { %v922_v32 = vpack.c.bf16 %v918_v30, %v918_v30  ;;  %v832_v41 = vadd.f32 %v828_v39, %v820_v36 }
 0x1d1   : > { %v1580_v38 = vpop.eup %1579 }
 0x1d2   : > { %1420 = vmatmul.msk.bf16.vlgmr.msra.gmra.mxu1 %vm696_vm0, %v922_v32  ;;  %v1582_v45 = vpop.eup %1581  ;;  %1583 = vrcp.f32 %v832_v41 }
 0x1d3   : > { %v851_v34 = vpop.f32.mrf.mxu0  ;;  %v868_v35 = vpop.f32.mrf.mxu1  ;;  %1585 = vrcp.f32 %v1815_v8 }
 0x1d4   : > { %v911_v37 = vadd.f32 %v868_v35, %v826_v22 }
 0x1d6   : > { %v919_v40 = vmul.f32 %v1580_v38, %v911_v37  ;;  %v1557_v38 = vld [vmem:[%s2227_s26] ss:$0 sm:$0xff]  ;;  %s2231_s26 = sld [smem:[#allocation31_spill]] }
 0x1d8   : > { %v887_v42 = vpop.f32.mrf.mxu2  ;;  %v923_v43 = vpack.c.bf16 %v919_v40, %v919_v40  ;;  %v1584_v52 = vpop.eup %1583 }
 0x1d9   : > { %v912_v44 = vadd.f32 %v887_v42, %v827_v29  ;;  %v1586_v9 = vpop.eup %1585 }
 0x1da   : > { %1419 = vmatmul.msk.bf16.vlgmr.msra.gmra.mxu0 %vm696_vm0, %v923_v43  ;;  %v1023_v10 = vmul.f32 32.0, %v1586_v9  ;;  %vm1027_vm3 = vweird.f32 %v1586_v9  ;;  %v1460_v43 = vld [vmem:[%s2228_s28 + $0x10] sm:$0xff] }
 0x1db   : > { %v920_v46 = vmul.f32 %v1582_v45, %v912_v44  ;;  %v870_v47 = vpop.f32.mrf.mxu1 }
 0x1dc   : > { %v1024_v11 = vsub.f32 1.0, %v1023_v10  ;;  %s1221_s16 = scalar_lea.hbm %s2231_s26, %s1450_s27  ;;  %s1735_s22 = scalar_lea.hbm %s2231_s26, 16 }
 0x1dd   : > { %v924_v48 = vpack.c.bf16 %v920_v46, %v920_v46  ;;  %v1459_v46 = vld [vmem:[%s2228_s28 + $0x8] sm:$0xff]  ;;  %s1225_s5 = sshll.u32 %s1221_s16, 4  ;;  %s1226_s5 = int_to_ptr.hbm [resolvable:$true] %s1225_s5 }
 0x1de   : > { %v1025_v12 = vmul.f32 %v1586_v9, %v1024_v11  ;;  %s1729_s9 = sshra.s32 %s1226_s5, 4  ;;  %s1730_s9 = int_to_ptr.hbm [resolvable:$true] %s1729_s9 }
 0x1df   : > { %1421 = vmatmul.msk.bf16.vlgmr.msra.gmra.mxu2 %vm696_vm0, %v924_v48  ;;  %s1731_s11 = scalar_lea.hbm %s1730_s9, 8  ;;  %p1736_p12 = scmp.lt.s32.totalorder %s1730_s9, %s2231_s26 }
 0x1e0   : > { %v889_v49 = vpop.f32.mrf.mxu2  ;;  %v906_v50 = vpop.f32.mrf.mxu3  ;;  %v1026_v13 = vadd.f32 %v1586_v9, %v1025_v12  ;;  %p1732_p1 = scmp.ne.s32.totalorder %s1730_s9, %s1731_s11  ;;  %p1737_p13 = scmp.lt.s32.totalorder %s1735_s22, %s1731_s11 }
 0x1e1   : > { %v913_v51 = vadd.f32 %v906_v50, %v828_v39  ;;  %v1461_v39 = vld [vmem:[%s2228_s28 + $0x18] sm:$0xff]  ;;  %v1458_v49 = vld [vmem:[%s2228_s28] sm:$0xff] }
 0x1e2   : > { %v2092_v14 = vsel %vm1027_vm3, %v1586_v9, %v1026_v13  ;;  %1166 = vmatpush.bf16.msrb.mxu1 %v1461_v39  ;;  %v1558_v9 = vld [vmem:[%s2229_s13] ss:$0 sm:$0xff]  ;;  %p1733_p4 = pnand %p1732_p1, %p1982_p7  ;;  %p1738_p0 = por %p1737_p13, %p1736_p12 }
 0x1e3   : > { %v921_v53 = vmul.f32 %v1584_v52, %v913_v51 }
 0x1e4   : > { %p1734_p10 = pneg %p1733_p4 }
 0x1e5   : > { %v925_v54 = vpack.c.bf16 %v921_v53, %v921_v53 }
 0x1e6   : > { %1167 = vmatpush.bf16.msrb.mxu1 %v1460_v43  ;;  %p1739_p3 = pnand %p1738_p0, %p1734_p10 }
 0x1e7   : > { %1422 = vmatmul.msk.bf16.vlgmr.msra.gmra.mxu3 %vm696_vm0, %v925_v54 }
 0x1e8   : > { %v908_v55 = vpop.f32.mrf.mxu3 }
 0x1ea   : > { %1168 = vmatpush.bf16.msrb.mxu1 %v1459_v46 }
 0x1ee   : > { %1169 = vmatpush.bf16.msrb.mxu1 %v1458_v49 }
 0x24f   : > { %v963_v56 = vpop.f32.mrf.mxu1 }
 0x257   : > { %v944_v57 = vpop.f32.mrf.mxu0  ;;  %v965_v58 = vpop.f32.mrf.mxu1 }
 0x258   : > { %v964_v61 = vadd.f32 %v963_v56, %v944_v57 }
 0x25f   : > { %v946_v59 = vpop.f32.mrf.mxu0 }
 0x262   : > { %v984_v60 = vpop.f32.mrf.mxu2 }
 0x263   : > { %v988_v62 = vadd.f32 %v984_v60, %v964_v61 }
 0x26a   : > { %v986_v0 = vpop.f32.mrf.mxu2  ;;  %v1006_v1 = vpop.f32.mrf.mxu3 }
 0x26b   : > { %v1010_v2 = vadd.f32 %v1006_v1, %v988_v62 }
 0x26d   : > { %v1015_v4 = vadd.f32 %v1554_v63, %v1010_v2  ;;  %v1816_v2 = vmov -1.0  }
 0x26f   : > { %v1017_v5 = vadd.f32 %v1016_v3, %v1015_v4 }
 0x271   : > { %v1019_v6 = vsel %vm1018_vm2, %v1017_v5, 0.0 }
 0x272   : > { %v1008_v7 = vpop.f32.mrf.mxu3  ;;  %1020 = vadd.xlane.f32.xlu2 %v1019_v6 }
 0x2e5   : > { %v1021_v15 = vpop.xlane.xlu2 %1020 }
 0x2e6   : > { %v1029_v16 = vmul.f32 %v2092_v14, %v1021_v15 }
 0x2e8   : > { %v1030_v17 = vsub.f32 %v1017_v5, %v1029_v16 }
 0x2ea   : > { %v1031_v18 = vmul.f32 %v1030_v17, %v1030_v17 }
 0x2ec   : > { %v1032_v19 = vsel %vm1018_vm2, %v1031_v18, 0.0 }
 0x2ed   : > { %1033 = vadd.xlane.f32.xlu0 %v1032_v19 }
 0x360   : > { %v1034_v22 = vpop.xlane.xlu0 %1033 }
 0x361   : > { %v1035_v23 = vmul.f32 %v1034_v22, %v2092_v14 }
 0x363   : > { %v1036_v24 = vadd.f32 1e-12, %v1035_v23 }
 0x365   : > { %1587 = vrsqrt.f32 %v1036_v24  ;;  %vm1043_vm5 = vweird.f32 %v1036_v24 }
 0x36b   : > { %v1588_v25 = vpop.eup %1587 }
 0x36c   : > { %v1038_v26 = vmul.f32 %v1588_v25, %v1036_v24  ;;  %vm1044_vm4 = vweird.f32 %v1588_v25 }
 0x36d   : > { %vm1045_vm6 = vmor %vm1043_vm5, %vm1044_vm4 }
 0x36e   : > { %v1039_v27 = vmul.f32 %v1588_v25, %v1038_v26 }
 0x370   : > { %v1040_v28 = vmul.f32 0.5, %v1039_v27 }
 0x372   : > { %v1041_v29 = vsub.f32 1.5, %v1040_v28 }
 0x374   : > { %v1042_v30 = vmul.f32 %v1588_v25, %v1041_v29 }
 0x376   : > { %v1046_v32 = vsel %vm1045_vm6, %v1588_v25, %v1042_v30  ;;  %v1559_v30 = vld [vmem:[%s2230_s12] ss:$0 sm:$0xff] }
 0x377   : > { %v1047_v34 = vmul.f32 %v1046_v32, %v1030_v17  ;;  %v1560_v32 = vld [vmem:[%s2233_s14] ss:$0 sm:$0xff] }
 0x379   : > { %v1052_v35 = vmul.f32 %v1555_v31, %v1047_v34 }
 0x37b   : > { %v1057_v36 = vadd.f32 %v1556_v33, %v1052_v35 }
 0x37d   : > { %v1058_v37 = vpack.c.bf16 %v1057_v36, %v1057_v36 }
 0x37f   : > { %1431 = vmatmul.msk.bf16.vlgmr.msrb.gmra.mxu0 %vm1018_vm2, %v1058_v37 }
 0x3fc   : > { %v1091_v40 = vpop.f32.mrf.mxu0 }
 0x3fd   : > { %v1092_v41 = vadd.f32 %v1557_v38, %v1091_v40 }
 0x3ff   : > { %v1096_v42 = vmul.f32 0.70710677, %v1092_v41  ;;  %v1095_v5 = vmul.f32 0.5, %v1092_v41 }
 0x401   : > { %v1099_v44 = vand.u32 2147483647, %v1096_v42  ;;  %vm1097_vm7 = vcmp.ge.f32.partialorder %v1096_v42, 0.0 }
 0x402   : > { %v1098_v3 = vsel %vm1097_vm7, 1.0, %v1816_v2 }
 0x403   : > { %v1100_v45 = vmul.f32 0.3275911, %v1099_v44  ;;  %v1112_v51 = vsub.f32 0.0, %v1099_v44 }
 0x404   : > { %v1093_v47 = vpop.f32.mrf.mxu0 }
 0x405   : > { %v1101_v48 = vadd.f32 1.0, %v1100_v45  ;;  %v1113_v54 = vmul.f32 %v1112_v51, %v1099_v44 }
 0x407   : > { %1589 = vrcp.f32 %v1101_v48  ;;  %v1114_v57 = vmul.f32 1.442695, %v1113_v54 }
 0x409   : > { %1591 = vpow2.f32 %v1114_v57 }
 0x40d   : > { %v1590_v50 = vpop.eup %1589 }
 0x40e   : > { %v1103_v52 = vmul.f32 1.0614054, %v1590_v50 }
 0x40f   : > { %v1592_v63 = vpop.eup %1591 }
 0x410   : > { %v1104_v53 = vadd.f32 -1.4531521, %v1103_v52 }
 0x412   : > { %v1105_v55 = vmul.f32 %v1590_v50, %v1104_v53 }
 0x414   : > { %v1106_v56 = vadd.f32 1.4214138, %v1105_v55 }
 0x416   : > { %v1107_v58 = vmul.f32 %v1590_v50, %v1106_v56 }
 0x418   : > { %v1108_v59 = vadd.f32 -0.28449672, %v1107_v58 }
 0x41a   : > { %v1109_v60 = vmul.f32 %v1590_v50, %v1108_v59 }
 0x41c   : > { %v1110_v61 = vadd.f32 0.2548296, %v1109_v60 }
 0x41e   : > { %v1111_v62 = vmul.f32 %v1590_v50, %v1110_v61 }
 0x420   : > { %v1116_v0 = vmul.f32 %v1592_v63, %v1111_v62 }
 0x422   : > { %v1117_v1 = vsub.f32 1.0, %v1116_v0 }
 0x424   : > { %v1118_v4 = vmul.f32 %v1117_v1, %v1098_v3 }
 0x426   : > { %v1119_v6 = vadd.f32 1.0, %v1118_v4 }
 0x428   : > { %v1120_v7 = vmul.f32 %v1119_v6, %v1095_v5 }
 0x42a   : > { %v1129_v8 = vpack.c.bf16 %v1120_v7, %v1120_v7 }
 0x42c   : > { %1448 = vmatmul.msk.bf16.vlgmr.msrb.gmra.mxu1 %vm1158_vm8, %v1129_v8 }
 0x4a9   : > { %v1171_v10 = vpop.f32.mrf.mxu1 }
 0x4aa   : > { %v1172_v11 = vadd.f32 %v1558_v9, %v1171_v10 }
 0x4ac   : > { %v1175_v12 = vadd.f32 %v1172_v11, %v1057_v36 }
 0x4ae   : > { %v1176_v13 = vsel %vm1018_vm2, %v1175_v12, 0.0 }
 0x4af   : > { %1177 = vadd.xlane.f32.xlu1 %v1176_v13 }
 0x4b1   : > { %v1173_v15 = vpop.f32.mrf.mxu1 }
 0x522   : > { %v1178_v16 = vpop.xlane.xlu1 %1177 }
 0x523   : > { %v1179_v17 = vmul.f32 %v1178_v16, %v2092_v14 }
 0x525   : > { %v1180_v18 = vsub.f32 %v1175_v12, %v1179_v17 }
 0x527   : > { %v1181_v19 = vmul.f32 %v1180_v18, %v1180_v18 }
 0x529   : > { %v1182_v20 = vsel %vm1018_vm2, %v1181_v19, 0.0 }
 0x52a   : > { %1183 = vadd.xlane.f32.xlu2 %v1182_v20 }
 0x59d   : > { %v1184_v21 = vpop.xlane.xlu2 %1183 }
 0x59e   : > { %v1185_v22 = vmul.f32 %v1184_v21, %v2092_v14 }
 0x5a0   : > { %v1186_v23 = vadd.f32 1e-12, %v1185_v22 }
 0x5a2   : > { %1593 = vrsqrt.f32 %v1186_v23  ;;  %vm1193_vm10 = vweird.f32 %v1186_v23 }
 0x5a8   : > { %v1594_v24 = vpop.eup %1593 }
 0x5a9   : > { %v1188_v25 = vmul.f32 %v1594_v24, %v1186_v23  ;;  %vm1194_vm9 = vweird.f32 %v1594_v24 }
 0x5aa   : > { %vm1195_vm11 = vmor %vm1193_vm10, %vm1194_vm9 }
 0x5ab   : > { %v1189_v26 = vmul.f32 %v1594_v24, %v1188_v25 }
 0x5ad   : > { %v1190_v27 = vmul.f32 0.5, %v1189_v26 }
 0x5af   : > { %v1191_v28 = vsub.f32 1.5, %v1190_v27 }
 0x5b1   : > { %v1192_v29 = vmul.f32 %v1594_v24, %v1191_v28 }
 0x5b3   : > { %v1196_v14 = vsel %vm1195_vm11, %v1594_v24, %v1192_v29 }
 0x5b4   : > { %v1197_v31 = vmul.f32 %v1196_v14, %v1180_v18 }
 0x5b6   : > { %v1202_v33 = vmul.f32 %v1559_v30, %v1197_v31 }
 0x5b8   : > { %v1207_v34 = vadd.f32 %v1560_v32, %v1202_v33 }
 0x5ba   : > { %1208 = vst.msk [vmem:[%s658_s21] sm:$0xff] %vm1018_vm2, %v1207_v34 }
 0x5bb   : > { %1742 = shalt.err (!%p1739_p3)
}
 0x5bc   : > { %1474 = dma.vmem_to_hbm [thread:$0]  (%p1982_p7), %s1224_s17, 128, %s1226_s5, %s1210_s29  }
 0x5bd PF: > { %s2234_s15 = sld [smem:[#allocation16_spill]]  ;;  %p1491_p5 = pnand %p1394_p11, %p1942_p6 }
 0x5bf   : > { %p1492_p9 = pneg %p1491_p5 }
 0x5c3   : > { %s1237_s18 = sand.u32 1, %s2234_s15  }
 0x5c4   : > { %s1238_s20 = scalar_lea.sflag [#allocation4], %s1237_s18 }
 0x5c5   : > { %1784 = dma.done.wait (%p1492_p9), %s1238_s20, 128  }
 0x5c6   : > { %1786 = vsyncadd (%p1492_p9), %s1238_s20, 4294967168  ;;  %s35_s23 = sadd.s32 1, %s1809_s23   ;;  %s2236_s16 = sld [smem:[#allocation17_spill]] }
 0x5c7   : > { %p32_p2 = scmp.ge.s32.totalorder %s35_s23, 4   ;;  %s2237_s20 = sld [smem:[#allocation22_spill]] }
 0x5c8   : > { %s2238_s21 = sld [smem:[#allocation18_spill]]  ;;  %s2240_s18 = smov %s1793_s19 }
 0x5c9   : > { %s2239_s22 = sld [smem:[#allocation20_spill]]  ;;  %34 = sbr.rel (!%p32_p2) target bundleno = 19 (0x13), region = 158 }
 0x5cc   : > { %s2241_s19 = smov %s2236_s16 }
 0x5ce   :  { %1244 = vsyncpa [#allocation3], 1 }
 0x5cf   :  { %1246 = vsyncpa [#allocation3 + $0x1], 1 }
 0x5d0   :  { %1247 = vsyncpa [#allocation6], 1 }
 0x5d1   :  { %1249 = vsyncpa [#allocation6 + $0x1], 1 }
 0x5d2   :  { %1250 = vsyncpa [#allocation9], 1 }
 0x5d3   :  { %1251 = vsyncpa [#allocation4], 1 }
 0x5d4   :  { %1253 = vsyncpa [#allocation4 + $0x1], 1 }

</bundles_post_ra>
